<compile_context>
chip_gen: v5e
topology: v5e:2x2
jax: 0.10.0
libtpu: 0.0.40
codegen_flags: <defaults>
</compile_context>

<pallas_src>
import functools
import numpy as np
import jax
import jax.numpy as jnp
from jax.experimental import pallas as pl
from jax.experimental.pallas import tpu as pltpu

CHANNELS = 32
NUM_LAYERS = 2
HEADS = 4
NUM_EDGE_TYPES = 84       # Embedding(84, channels)
BN_EPS = 1e-5
NEG_INF = -1e30


# ----------------------------- fused Pallas kernel ---------------------------

def _gps_graph_kernel(counts_ref,                                     # SMEM [B]
                      x_ref, src_oh_ref, dstT_ref, eemb_ref,          # per-graph tiles
                      gw1_ref, gb1_ref, gw2_ref, gb2_ref,             # GINE nn
                      wqkv_ref, bqkv_ref, wo_ref, bo_ref,             # MHA
                      mw1_ref, mb1_ref, mw2_ref, mb2_ref,             # GPS MLP
                      out_ref, *, num_layers, heads):
    f32 = jnp.float32
    g = pl.program_id(0)
    n_valid = counts_ref[g]                          # nodes in this graph

    x = x_ref[0]                                     # [L, C] padded node features
    src_oh = src_oh_ref[0].astype(f32)               # [E, L] one-hot (bf16 exact)
    dstT = dstT_ref[0].astype(f32)                   # [L, E] one-hot scatter-add
    eemb = eemb_ref[0]                               # [E, C] edge embeddings

    L, C = x.shape
    dh = C // heads
    inv_bn = 1.0 / float(np.sqrt(1.0 + BN_EPS))      # BatchNorm1d eval, default stats

    # In-kernel masks from the scalar-prefetched node count (no mask DMA):
    col = jax.lax.broadcasted_iota(jnp.int32, (1, L), 1)
    key_bias = jnp.where(col < n_valid, 0.0, NEG_INF)                  # [1, L]
    row = jax.lax.broadcasted_iota(jnp.int32, (L, 1), 0)
    valid = (row < n_valid).astype(f32)                                # [L, 1]

    for l in range(num_layers):
        # ---------------- local branch: GINEConv (eps = 0) -------------------
        x_src = jnp.dot(src_oh, x, preferred_element_type=f32)         # x[src]  [E, C]
        msg = jnp.maximum(x_src + eemb, 0.0)                           # relu(x_j + e_ji)
        aggr = jnp.dot(dstT, msg, preferred_element_type=f32)          # scatter-add [L, C]
        h = x + aggr                                                   # (1+eps)*x + aggr
        h = jnp.maximum(
            jnp.dot(h, gw1_ref[l], preferred_element_type=f32) + gb1_ref[l], 0.0)
        h_local = jnp.dot(h, gw2_ref[l], preferred_element_type=f32) + gb2_ref[l]

        # ---------------- global branch: per-graph MHA ------------------------
        # key_padding_mask semantics via key_bias; 1/sqrt(dh) folded into wq/bq.
        qkv = jnp.dot(x, wqkv_ref[l], preferred_element_type=f32) + bqkv_ref[l]  # [L, 128]
        wo_l = wo_ref[l]                                                          # [C, C]
        o = jnp.zeros((L, C), f32)
        for hd in range(heads):
            lo = hd * dh
            qh = qkv[:, lo:lo + dh]
            kh = qkv[:, C + lo:C + lo + dh]
            vh = qkv[:, 2 * C + lo:2 * C + lo + dh]
            s = jax.lax.dot_general(qh, kh, (((1,), (1,)), ((), ())),
                                    preferred_element_type=f32) + key_bias        # [L, L]
            s = s - jnp.max(s, axis=-1, keepdims=True)
            p = jnp.exp(s)
            p = p * pl.reciprocal(jnp.sum(p, axis=-1, keepdims=True), approx=True)
            oh = jnp.dot(p, vh, preferred_element_type=f32)                        # [L, dh]
            # fold the head concat into the output projection:
            #   concat(heads) @ Wo == sum_h head_h @ Wo[h*dh:(h+1)*dh, :]
            o = o + jnp.dot(oh, wo_l[lo:lo + dh, :], preferred_element_type=f32)
        h_attn = o + bo_ref[l]

        # -------- combine: residuals + eval-mode BatchNorms + MLP ------------
        h1 = (h_local + x) * inv_bn          # norm1(dropout(conv(x)) + x)
        h2 = (h_attn + x) * inv_bn           # norm2(dropout(attn(x)) + x)
        out = h1 + h2                        # sum(hs)
        m = jnp.maximum(
            jnp.dot(out, mw1_ref[l], preferred_element_type=f32) + mb1_ref[l], 0.0)
        m = jnp.dot(m, mw2_ref[l], preferred_element_type=f32) + mb2_ref[l]
        x = (out + m) * inv_bn               # norm3(out + mlp(out))

    # ---------------- global_add_pool for this graph (mask padded rows) ------
    out_ref[0] = jnp.sum(x * valid, axis=0, keepdims=True)             # [1, C]


# ----------------------------- wrapper ---------------------------------------

@functools.partial(jax.jit, static_argnums=(5, 6, 7))
def gps_forward(params, x, edge_index, edge_attr, batch, num_graphs,
                max_nodes, max_edges):
    """batch is assumed node-sorted by graph (PyG convention)."""
    N, C = x.shape
    E = edge_index.shape[1]
    B, L, Emax = num_graphs, max_nodes, max_edges
    src, dst = edge_index[0], edge_index[1]

    # ---- per-graph dense layout (the only to_dense_batch-style work, in XLA) --
    counts = jnp.bincount(batch, length=B).astype(jnp.int32)                 # [B]
    node_off = jnp.concatenate(
        [jnp.zeros((1,), jnp.int32), jnp.cumsum(counts)[:-1].astype(jnp.int32)])
    local_node = jnp.arange(N, dtype=jnp.int32) - node_off[batch]            # [N]
    x_dense = jnp.zeros((B, L, C), jnp.float32).at[batch, local_node].set(x)

    e_graph = batch[src]                                                      # [E]
    eg_oh = jax.nn.one_hot(e_graph, B, dtype=jnp.int32)                       # [E, B]
    local_e = jnp.take_along_axis(jnp.cumsum(eg_oh, axis=0),
                                  e_graph[:, None], axis=1)[:, 0] - 1         # [E]
    l_src = local_node[src]
    l_dst = local_node[dst]

    # bf16 one-hots: exact, half the DMA bytes of f32 gather/scatter matrices.
    src_oh = jnp.zeros((B, Emax, L), jnp.bfloat16).at[e_graph, local_e, l_src].set(1.0)
    dstT = jnp.zeros((B, L, Emax), jnp.bfloat16).at[e_graph, l_dst, local_e].set(1.0)
    eemb = params['edge_emb'][edge_attr]                                      # [E, C]
    eemb_d = jnp.zeros((B, Emax, C), jnp.float32).at[e_graph, local_e].set(eemb)

    def _resident(shape):           # grid-invariant weights: fetched once, kept in VMEM
        n = len(shape)
        return pl.BlockSpec(shape, lambda g, cnt, _n=n: (0,) * _n)

    kernel = functools.partial(_gps_graph_kernel,
                               num_layers=NUM_LAYERS, heads=HEADS)
    grid_spec = pltpu.PrefetchScalarGridSpec(
        num_scalar_prefetch=1,                       # counts -> SMEM
        grid=(B,),
        in_specs=[
            pl.BlockSpec((1, L, C), lambda g, cnt: (g, 0, 0)),       # x_dense
            pl.BlockSpec((1, Emax, L), lambda g, cnt: (g, 0, 0)),    # src_oh
            pl.BlockSpec((1, L, Emax), lambda g, cnt: (g, 0, 0)),    # dstT
            pl.BlockSpec((1, Emax, C), lambda g, cnt: (g, 0, 0)),    # eemb
            _resident(params['gw1'].shape), _resident(params['gb1'].shape),
            _resident(params['gw2'].shape), _resident(params['gb2'].shape),
            _resident(params['wqkv'].shape), _resident(params['bqkv'].shape),
            _resident(params['wo'].shape), _resident(params['bo'].shape),
            _resident(params['mw1'].shape), _resident(params['mb1'].shape),
            _resident(params['mw2'].shape), _resident(params['mb2'].shape),
        ],
        out_specs=pl.BlockSpec((1, 1, C), lambda g, cnt: (g, 0, 0)),
    )
    out = pl.pallas_call(
        kernel,
        grid_spec=grid_spec,
        out_shape=jax.ShapeDtypeStruct((B, 1, C), jnp.float32),
        compiler_params=pltpu.CompilerParams(
            dimension_semantics=("parallel",),       # megacore sharding on v7x
            vmem_limit_bytes=32 * 1024 * 1024),
    )(counts, x_dense, src_oh, dstT, eemb_d,
      params['gw1'], params['gb1'], params['gw2'], params['gb2'],
      params['wqkv'], params['bqkv'], params['wo'], params['bo'],
      params['mw1'], params['mb1'], params['mw2'], params['mb2'])
    return out.reshape(B, C)


# ----------------------------- parameters ------------------------------------

def init_params(key, channels, num_layers, heads=HEADS):
    C = channels
    dh = C // heads
    attn_scale = 1.0 / float(np.sqrt(dh))            # folded into wq/bq (free in-kernel)
    qkv_width = ((3 * C + 127) // 128) * 128         # lane-dense (128-wide) QKV slab
    s = 1.0 / float(np.sqrt(C))
    k_emb, *layer_keys = jax.random.split(key, num_layers + 1)
    params = {'edge_emb': jax.random.normal(k_emb, (NUM_EDGE_TYPES, C), jnp.float32)}
    names = ['gw1', 'gb1', 'gw2', 'gb2', 'wqkv', 'bqkv', 'wo', 'bo',
             'mw1', 'mb1', 'mw2', 'mb2']
    per = {n: [] for n in names}
    for lk in layer_keys:
        ks = jax.random.split(lk, 16)
        # GINE nn: Linear(C,C) -> ReLU -> Linear(C,C)   (weights stored [in, out])
        per['gw1'].append(jax.random.normal(ks[0], (C, C)) * s)
        per['gb1'].append(jax.random.normal(ks[1], (1, C)) * s)
        per['gw2'].append(jax.random.normal(ks[2], (C, C)) * s)
        per['gb2'].append(jax.random.normal(ks[3], (1, C)) * s)
        # MultiheadAttention: fused Q|K|V projection (scale folded, 128-padded)
        wq = jax.random.normal(ks[4], (C, C)) * s
        wk = jax.random.normal(ks[5], (C, C)) * s
        wv = jax.random.normal(ks[6], (C, C)) * s
        wqkv = jnp.concatenate([wq * attn_scale, wk, wv], axis=1)       # [C, 3C]
        per['wqkv'].append(jnp.zeros((C, qkv_width)).at[:, :3 * C].set(wqkv))
        bq = jax.random.normal(ks[7], (1, C)) * s
        bk = jax.random.normal(ks[8], (1, C)) * s
        bv = jax.random.normal(ks[9], (1, C)) * s
        bqkv = jnp.concatenate([bq * attn_scale, bk, bv], axis=1)       # [1, 3C]
        per['bqkv'].append(jnp.zeros((1, qkv_width)).at[:, :3 * C].set(bqkv))
        per['wo'].append(jax.random.normal(ks[10], (C, C)) * s)
        per['bo'].append(jax.random.normal(ks[11], (1, C)) * s)
        # GPSConv MLP: Linear(C, 2C) -> ReLU -> Linear(2C, C)
        per['mw1'].append(jax.random.normal(ks[12], (C, 2 * C)) * s)
        per['mb1'].append(jax.random.normal(ks[13], (1, 2 * C)) * s)
        per['mw2'].append(jax.random.normal(ks[14], (2 * C, C)) * (1.0 / float(np.sqrt(2 * C))))
        per['mb2'].append(jax.random.normal(ks[15], (1, C)) * s)
    for n in names:
        params[n] = jnp.stack(per[n]).astype(jnp.float32)   # [NUM_LAYERS, ...]
    return params


# ----------------------------- main -------------------------------------------

if __name__ == "__main__":
    key = jax.random.PRNGKey(0)
    k_x, k_p = jax.random.split(key, 2)

    nodes_per_graph = [8, 8]
    num_graphs = len(nodes_per_graph)
    N = sum(nodes_per_graph)
    C = CHANNELS
    E_per_graph = 16
    E = E_per_graph * num_graphs
    max_nodes = max(nodes_per_graph)
    max_edges = E_per_graph

    batch_np = np.repeat(np.arange(num_graphs), nodes_per_graph).astype(np.int32)

    rng = np.random.RandomState(0)
    src_list, dst_list, offset = [], [], 0
    for n in nodes_per_graph:
        src_list.append(rng.randint(0, n, size=E_per_graph) + offset)
        dst_list.append(rng.randint(0, n, size=E_per_graph) + offset)
        offset += n
    edge_index_np = np.stack([np.concatenate(src_list),
                              np.concatenate(dst_list)]).astype(np.int32)
    edge_attr_np = rng.randint(0, NUM_EDGE_TYPES, size=E).astype(np.int32)

    x = jax.random.normal(k_x, (N, C), jnp.float32)
    params = init_params(k_p, C, NUM_LAYERS)

    out = gps_forward(params, x,
                      jnp.asarray(edge_index_np),
                      jnp.asarray(edge_attr_np),
                      jnp.asarray(batch_np),
                      num_graphs, max_nodes, max_edges)
    out = jax.block_until_ready(out)

    assert out.shape == (num_graphs, C), out.shape
    assert bool(jnp.all(jnp.isfinite(out)))
    print("KERNEL_OK")
</pallas_src>

<mosaic_0001>
module attributes {stable_mosaic.version = 11 : i64} {
  func.func @_gps_graph_kernel(%arg0: i32, %arg1: memref<2xi32, #tpu.memory_space<smem>>, %arg2: memref<1x8x32xf32, #tpu.memory_space<vmem>>, %arg3: memref<1x16x8xbf16, #tpu.memory_space<vmem>>, %arg4: memref<1x8x16xbf16, #tpu.memory_space<vmem>>, %arg5: memref<1x16x32xf32, #tpu.memory_space<vmem>>, %arg6: memref<2x32x32xf32, #tpu.memory_space<vmem>>, %arg7: memref<2x1x32xf32, #tpu.memory_space<vmem>>, %arg8: memref<2x32x32xf32, #tpu.memory_space<vmem>>, %arg9: memref<2x1x32xf32, #tpu.memory_space<vmem>>, %arg10: memref<2x32x128xf32, #tpu.memory_space<vmem>>, %arg11: memref<2x1x128xf32, #tpu.memory_space<vmem>>, %arg12: memref<2x32x32xf32, #tpu.memory_space<vmem>>, %arg13: memref<2x1x32xf32, #tpu.memory_space<vmem>>, %arg14: memref<2x32x64xf32, #tpu.memory_space<vmem>>, %arg15: memref<2x1x64xf32, #tpu.memory_space<vmem>>, %arg16: memref<2x64x32xf32, #tpu.memory_space<vmem>>, %arg17: memref<2x1x32xf32, #tpu.memory_space<vmem>>, %arg18: memref<1x1x32xf32, #tpu.memory_space<vmem>>) attributes {dimension_semantics = [#tpu.dimension_semantics<parallel>], iteration_bounds = array<i64: 2>, scalar_prefetch = 1 : i64, scratch_operands = 0 : i64, tpu.core_type = #tpu.core_type<tc>, window_params = [{transform_indices = @transform_0, window_bounds = array<i64: 1, 8, 32>}, {transform_indices = @transform_1, window_bounds = array<i64: 1, 16, 8>}, {transform_indices = @transform_2, window_bounds = array<i64: 1, 8, 16>}, {transform_indices = @transform_3, window_bounds = array<i64: 1, 16, 32>}, {pipeline_mode = #tpu.pipeline_mode<synchronous>, transform_indices = @transform_4, window_bounds = array<i64: 2, 32, 32>}, {pipeline_mode = #tpu.pipeline_mode<synchronous>, transform_indices = @transform_5, window_bounds = array<i64: 2, 1, 32>}, {pipeline_mode = #tpu.pipeline_mode<synchronous>, transform_indices = @transform_6, window_bounds = array<i64: 2, 32, 32>}, {pipeline_mode = #tpu.pipeline_mode<synchronous>, transform_indices = @transform_7, window_bounds = array<i64: 2, 1, 32>}, {pipeline_mode = #tpu.pipeline_mode<synchronous>, transform_indices = @transform_8, window_bounds = array<i64: 2, 32, 128>}, {pipeline_mode = #tpu.pipeline_mode<synchronous>, transform_indices = @transform_9, window_bounds = array<i64: 2, 1, 128>}, {pipeline_mode = #tpu.pipeline_mode<synchronous>, transform_indices = @transform_10, window_bounds = array<i64: 2, 32, 32>}, {pipeline_mode = #tpu.pipeline_mode<synchronous>, transform_indices = @transform_11, window_bounds = array<i64: 2, 1, 32>}, {pipeline_mode = #tpu.pipeline_mode<synchronous>, transform_indices = @transform_12, window_bounds = array<i64: 2, 32, 64>}, {pipeline_mode = #tpu.pipeline_mode<synchronous>, transform_indices = @transform_13, window_bounds = array<i64: 2, 1, 64>}, {pipeline_mode = #tpu.pipeline_mode<synchronous>, transform_indices = @transform_14, window_bounds = array<i64: 2, 64, 32>}, {pipeline_mode = #tpu.pipeline_mode<synchronous>, transform_indices = @transform_15, window_bounds = array<i64: 2, 1, 32>}, {transform_indices = @transform_16, window_bounds = array<i64: 1, 1, 32>}]} {
    %0 = arith.index_cast %arg0 : i32 to index
    %1 = memref.load %arg1[%0] : memref<2xi32, #tpu.memory_space<smem>>
    %c0 = arith.constant 0 : index
    %c0_0 = arith.constant 0 : index
    %c0_1 = arith.constant 0 : index
    %2 = vector.load %arg2[%c0, %c0_0, %c0_1] : memref<1x8x32xf32, #tpu.memory_space<vmem>>, vector<1x8x32xf32>
    %3 = vector.shape_cast %2 : vector<1x8x32xf32> to vector<8x32xf32>
    %c0_2 = arith.constant 0 : index
    %c0_3 = arith.constant 0 : index
    %c0_4 = arith.constant 0 : index
    %4 = vector.load %arg3[%c0_2, %c0_3, %c0_4] : memref<1x16x8xbf16, #tpu.memory_space<vmem>>, vector<1x16x8xbf16>
    %5 = vector.shape_cast %4 : vector<1x16x8xbf16> to vector<16x8xbf16>
    %6 = arith.extf %5 : vector<16x8xbf16> to vector<16x8xf32>
    %c0_5 = arith.constant 0 : index
    %c0_6 = arith.constant 0 : index
    %c0_7 = arith.constant 0 : index
    %7 = vector.load %arg4[%c0_5, %c0_6, %c0_7] : memref<1x8x16xbf16, #tpu.memory_space<vmem>>, vector<1x8x16xbf16>
    %8 = vector.shape_cast %7 : vector<1x8x16xbf16> to vector<8x16xbf16>
    %9 = arith.extf %8 : vector<8x16xbf16> to vector<8x16xf32>
    %c0_8 = arith.constant 0 : index
    %c0_9 = arith.constant 0 : index
    %c0_10 = arith.constant 0 : index
    %10 = vector.load %arg5[%c0_8, %c0_9, %c0_10] : memref<1x16x32xf32, #tpu.memory_space<vmem>>, vector<1x16x32xf32>
    %11 = vector.shape_cast %10 : vector<1x16x32xf32> to vector<16x32xf32>
    %12 = tpu.iota {dimensions = array<i32: 1>} : vector<1x8xi32>
    %13 = vector.broadcast %1 : i32 to vector<1x8xi32>
    %14 = arith.cmpi slt, %12, %13 : vector<1x8xi32>
    %cst = arith.constant 0.000000e+00 : f32
    %cst_11 = arith.constant -1.000000e+30 : f32
    %15 = vector.broadcast %cst : f32 to vector<1x8xf32>
    %16 = vector.broadcast %cst_11 : f32 to vector<1x8xf32>
    %17 = arith.select %14, %15, %16 : vector<1x8xi1>, vector<1x8xf32>
    %18 = tpu.iota {dimensions = array<i32: 0>} : vector<8x1xi32>
    %19 = vector.broadcast %1 : i32 to vector<8x1xi32>
    %20 = arith.cmpi slt, %18, %19 : vector<8x1xi32>
    %21 = arith.extui %20 : vector<8x1xi1> to vector<8x1xi32>
    %22 = arith.sitofp %21 : vector<8x1xi32> to vector<8x1xf32>
    %cst_12 = arith.constant dense<0.000000e+00> : vector<16x32xf32>
    %23 = tpu.matmul %6, %3, %cst_12 {dimension_numbers = #tpu.dot_dimension_numbers<[1], [0], [0], [1], [0, 0, 1, 1], [], []>} : vector<16x8xf32>, vector<8x32xf32>, vector<16x32xf32> -> vector<16x32xf32>
    %24 = arith.addf %23, %11 : vector<16x32xf32>
    %cst_13 = arith.constant 0.000000e+00 : f32
    %25 = vector.broadcast %cst_13 : f32 to vector<16x32xf32>
    %26 = arith.maximumf %24, %25 : vector<16x32xf32>
    %cst_14 = arith.constant dense<0.000000e+00> : vector<8x32xf32>
    %27 = tpu.matmul %9, %26, %cst_14 {dimension_numbers = #tpu.dot_dimension_numbers<[1], [0], [0], [1], [0, 0, 1, 1], [], []>} : vector<8x16xf32>, vector<16x32xf32>, vector<8x32xf32> -> vector<8x32xf32>
    %28 = arith.addf %3, %27 : vector<8x32xf32>
    %c0_15 = arith.constant 0 : index
    %c0_16 = arith.constant 0 : index
    %c0_17 = arith.constant 0 : index
    %29 = vector.load %arg6[%c0_15, %c0_16, %c0_17] : memref<2x32x32xf32, #tpu.memory_space<vmem>>, vector<1x32x32xf32>
    %30 = vector.shape_cast %29 : vector<1x32x32xf32> to vector<32x32xf32>
    %cst_18 = arith.constant dense<0.000000e+00> : vector<8x32xf32>
    %31 = tpu.matmul %28, %30, %cst_18 {dimension_numbers = #tpu.dot_dimension_numbers<[1], [0], [0], [1], [0, 0, 1, 1], [], []>} : vector<8x32xf32>, vector<32x32xf32>, vector<8x32xf32> -> vector<8x32xf32>
    %c0_19 = arith.constant 0 : index
    %c0_20 = arith.constant 0 : index
    %c0_21 = arith.constant 0 : index
    %32 = vector.load %arg7[%c0_19, %c0_20, %c0_21] : memref<2x1x32xf32, #tpu.memory_space<vmem>>, vector<1x1x32xf32>
    %33 = vector.shape_cast %32 : vector<1x1x32xf32> to vector<1x32xf32>
    %34 = vector.broadcast %33 : vector<1x32xf32> to vector<8x32xf32>
    %35 = arith.addf %31, %34 : vector<8x32xf32>
    %cst_22 = arith.constant 0.000000e+00 : f32
    %36 = vector.broadcast %cst_22 : f32 to vector<8x32xf32>
    %37 = arith.maximumf %35, %36 : vector<8x32xf32>
    %c0_23 = arith.constant 0 : index
    %c0_24 = arith.constant 0 : index
    %c0_25 = arith.constant 0 : index
    %38 = vector.load %arg8[%c0_23, %c0_24, %c0_25] : memref<2x32x32xf32, #tpu.memory_space<vmem>>, vector<1x32x32xf32>
    %39 = vector.shape_cast %38 : vector<1x32x32xf32> to vector<32x32xf32>
    %cst_26 = arith.constant dense<0.000000e+00> : vector<8x32xf32>
    %40 = tpu.matmul %37, %39, %cst_26 {dimension_numbers = #tpu.dot_dimension_numbers<[1], [0], [0], [1], [0, 0, 1, 1], [], []>} : vector<8x32xf32>, vector<32x32xf32>, vector<8x32xf32> -> vector<8x32xf32>
    %c0_27 = arith.constant 0 : index
    %c0_28 = arith.constant 0 : index
    %c0_29 = arith.constant 0 : index
    %41 = vector.load %arg9[%c0_27, %c0_28, %c0_29] : memref<2x1x32xf32, #tpu.memory_space<vmem>>, vector<1x1x32xf32>
    %42 = vector.shape_cast %41 : vector<1x1x32xf32> to vector<1x32xf32>
    %43 = vector.broadcast %42 : vector<1x32xf32> to vector<8x32xf32>
    %44 = arith.addf %40, %43 : vector<8x32xf32>
    %c0_30 = arith.constant 0 : index
    %c0_31 = arith.constant 0 : index
    %c0_32 = arith.constant 0 : index
    %45 = vector.load %arg10[%c0_30, %c0_31, %c0_32] : memref<2x32x128xf32, #tpu.memory_space<vmem>>, vector<1x32x128xf32>
    %46 = vector.shape_cast %45 : vector<1x32x128xf32> to vector<32x128xf32>
    %cst_33 = arith.constant dense<0.000000e+00> : vector<8x128xf32>
    %47 = tpu.matmul %3, %46, %cst_33 {dimension_numbers = #tpu.dot_dimension_numbers<[1], [0], [0], [1], [0, 0, 1, 1], [], []>} : vector<8x32xf32>, vector<32x128xf32>, vector<8x128xf32> -> vector<8x128xf32>
    %c0_34 = arith.constant 0 : index
    %c0_35 = arith.constant 0 : index
    %c0_36 = arith.constant 0 : index
    %48 = vector.load %arg11[%c0_34, %c0_35, %c0_36] : memref<2x1x128xf32, #tpu.memory_space<vmem>>, vector<1x1x128xf32>
    %49 = vector.shape_cast %48 : vector<1x1x128xf32> to vector<1x128xf32>
    %50 = vector.broadcast %49 : vector<1x128xf32> to vector<8x128xf32>
    %51 = arith.addf %47, %50 : vector<8x128xf32>
    %c0_37 = arith.constant 0 : index
    %c0_38 = arith.constant 0 : index
    %c0_39 = arith.constant 0 : index
    %52 = vector.load %arg12[%c0_37, %c0_38, %c0_39] : memref<2x32x32xf32, #tpu.memory_space<vmem>>, vector<1x32x32xf32>
    %53 = vector.shape_cast %52 : vector<1x32x32xf32> to vector<32x32xf32>
    %cst_40 = arith.constant 0.000000e+00 : f32
    %54 = vector.broadcast %cst_40 : f32 to vector<8x32xf32>
    %55 = vector.extract_strided_slice %51 {offsets = [0, 0], sizes = [8, 8], strides = [1, 1]} : vector<8x128xf32> to vector<8x8xf32>
    %56 = vector.extract_strided_slice %51 {offsets = [0, 32], sizes = [8, 8], strides = [1, 1]} : vector<8x128xf32> to vector<8x8xf32>
    %57 = vector.extract_strided_slice %51 {offsets = [0, 64], sizes = [8, 8], strides = [1, 1]} : vector<8x128xf32> to vector<8x8xf32>
    %cst_41 = arith.constant dense<0.000000e+00> : vector<8x8xf32>
    %58 = tpu.matmul %55, %56, %cst_41 {dimension_numbers = #tpu.dot_dimension_numbers<[1], [1], [0], [0], [0, 0, 1, 0], [], []>} : vector<8x8xf32>, vector<8x8xf32>, vector<8x8xf32> -> vector<8x8xf32>
    %59 = vector.broadcast %17 : vector<1x8xf32> to vector<8x8xf32>
    %60 = arith.addf %58, %59 : vector<8x8xf32>
    %cst_42 = arith.constant dense<0xFF800000> : vector<8xf32>
    %61 = vector.multi_reduction <maximumf>, %60, %cst_42 [1] : vector<8x8xf32> to vector<8xf32>
    %62 = vector.shape_cast %61 : vector<8xf32> to vector<8x1xf32>
    %63 = vector.broadcast %62 : vector<8x1xf32> to vector<8x8xf32>
    %64 = arith.subf %60, %63 : vector<8x8xf32>
    %65 = math.exp %64 : vector<8x8xf32>
    %cst_43 = arith.constant dense<0.000000e+00> : vector<8xf32>
    %66 = vector.multi_reduction <add>, %65, %cst_43 [1] : vector<8x8xf32> to vector<8xf32>
    %67 = vector.shape_cast %66 : vector<8xf32> to vector<8x1xf32>
    %68 = tpu.reciprocal %67 {approx = true} : vector<8x1xf32> -> vector<8x1xf32>
    %69 = vector.broadcast %68 : vector<8x1xf32> to vector<8x8xf32>
    %70 = arith.mulf %65, %69 : vector<8x8xf32>
    %cst_44 = arith.constant dense<0.000000e+00> : vector<8x8xf32>
    %71 = tpu.matmul %70, %57, %cst_44 {dimension_numbers = #tpu.dot_dimension_numbers<[1], [0], [0], [1], [0, 0, 1, 1], [], []>} : vector<8x8xf32>, vector<8x8xf32>, vector<8x8xf32> -> vector<8x8xf32>
    %72 = vector.extract_strided_slice %53 {offsets = [0, 0], sizes = [8, 32], strides = [1, 1]} : vector<32x32xf32> to vector<8x32xf32>
    %cst_45 = arith.constant dense<0.000000e+00> : vector<8x32xf32>
    %73 = tpu.matmul %71, %72, %cst_45 {dimension_numbers = #tpu.dot_dimension_numbers<[1], [0], [0], [1], [0, 0, 1, 1], [], []>} : vector<8x8xf32>, vector<8x32xf32>, vector<8x32xf32> -> vector<8x32xf32>
    %74 = arith.addf %54, %73 : vector<8x32xf32>
    %75 = vector.extract_strided_slice %51 {offsets = [0, 8], sizes = [8, 8], strides = [1, 1]} : vector<8x128xf32> to vector<8x8xf32>
    %76 = vector.extract_strided_slice %51 {offsets = [0, 40], sizes = [8, 8], strides = [1, 1]} : vector<8x128xf32> to vector<8x8xf32>
    %77 = vector.extract_strided_slice %51 {offsets = [0, 72], sizes = [8, 8], strides = [1, 1]} : vector<8x128xf32> to vector<8x8xf32>
    %cst_46 = arith.constant dense<0.000000e+00> : vector<8x8xf32>
    %78 = tpu.matmul %75, %76, %cst_46 {dimension_numbers = #tpu.dot_dimension_numbers<[1], [1], [0], [0], [0, 0, 1, 0], [], []>} : vector<8x8xf32>, vector<8x8xf32>, vector<8x8xf32> -> vector<8x8xf32>
    %79 = vector.broadcast %17 : vector<1x8xf32> to vector<8x8xf32>
    %80 = arith.addf %78, %79 : vector<8x8xf32>
    %cst_47 = arith.constant dense<0xFF800000> : vector<8xf32>
    %81 = vector.multi_reduction <maximumf>, %80, %cst_47 [1] : vector<8x8xf32> to vector<8xf32>
    %82 = vector.shape_cast %81 : vector<8xf32> to vector<8x1xf32>
    %83 = vector.broadcast %82 : vector<8x1xf32> to vector<8x8xf32>
    %84 = arith.subf %80, %83 : vector<8x8xf32>
    %85 = math.exp %84 : vector<8x8xf32>
    %cst_48 = arith.constant dense<0.000000e+00> : vector<8xf32>
    %86 = vector.multi_reduction <add>, %85, %cst_48 [1] : vector<8x8xf32> to vector<8xf32>
    %87 = vector.shape_cast %86 : vector<8xf32> to vector<8x1xf32>
    %88 = tpu.reciprocal %87 {approx = true} : vector<8x1xf32> -> vector<8x1xf32>
    %89 = vector.broadcast %88 : vector<8x1xf32> to vector<8x8xf32>
    %90 = arith.mulf %85, %89 : vector<8x8xf32>
    %cst_49 = arith.constant dense<0.000000e+00> : vector<8x8xf32>
    %91 = tpu.matmul %90, %77, %cst_49 {dimension_numbers = #tpu.dot_dimension_numbers<[1], [0], [0], [1], [0, 0, 1, 1], [], []>} : vector<8x8xf32>, vector<8x8xf32>, vector<8x8xf32> -> vector<8x8xf32>
    %92 = vector.extract_strided_slice %53 {offsets = [8, 0], sizes = [8, 32], strides = [1, 1]} : vector<32x32xf32> to vector<8x32xf32>
    %cst_50 = arith.constant dense<0.000000e+00> : vector<8x32xf32>
    %93 = tpu.matmul %91, %92, %cst_50 {dimension_numbers = #tpu.dot_dimension_numbers<[1], [0], [0], [1], [0, 0, 1, 1], [], []>} : vector<8x8xf32>, vector<8x32xf32>, vector<8x32xf32> -> vector<8x32xf32>
    %94 = arith.addf %74, %93 : vector<8x32xf32>
    %95 = vector.extract_strided_slice %51 {offsets = [0, 16], sizes = [8, 8], strides = [1, 1]} : vector<8x128xf32> to vector<8x8xf32>
    %96 = vector.extract_strided_slice %51 {offsets = [0, 48], sizes = [8, 8], strides = [1, 1]} : vector<8x128xf32> to vector<8x8xf32>
    %97 = vector.extract_strided_slice %51 {offsets = [0, 80], sizes = [8, 8], strides = [1, 1]} : vector<8x128xf32> to vector<8x8xf32>
    %cst_51 = arith.constant dense<0.000000e+00> : vector<8x8xf32>
    %98 = tpu.matmul %95, %96, %cst_51 {dimension_numbers = #tpu.dot_dimension_numbers<[1], [1], [0], [0], [0, 0, 1, 0], [], []>} : vector<8x8xf32>, vector<8x8xf32>, vector<8x8xf32> -> vector<8x8xf32>
    %99 = vector.broadcast %17 : vector<1x8xf32> to vector<8x8xf32>
    %100 = arith.addf %98, %99 : vector<8x8xf32>
    %cst_52 = arith.constant dense<0xFF800000> : vector<8xf32>
    %101 = vector.multi_reduction <maximumf>, %100, %cst_52 [1] : vector<8x8xf32> to vector<8xf32>
    %102 = vector.shape_cast %101 : vector<8xf32> to vector<8x1xf32>
    %103 = vector.broadcast %102 : vector<8x1xf32> to vector<8x8xf32>
    %104 = arith.subf %100, %103 : vector<8x8xf32>
    %105 = math.exp %104 : vector<8x8xf32>
    %cst_53 = arith.constant dense<0.000000e+00> : vector<8xf32>
    %106 = vector.multi_reduction <add>, %105, %cst_53 [1] : vector<8x8xf32> to vector<8xf32>
    %107 = vector.shape_cast %106 : vector<8xf32> to vector<8x1xf32>
    %108 = tpu.reciprocal %107 {approx = true} : vector<8x1xf32> -> vector<8x1xf32>
    %109 = vector.broadcast %108 : vector<8x1xf32> to vector<8x8xf32>
    %110 = arith.mulf %105, %109 : vector<8x8xf32>
    %cst_54 = arith.constant dense<0.000000e+00> : vector<8x8xf32>
    %111 = tpu.matmul %110, %97, %cst_54 {dimension_numbers = #tpu.dot_dimension_numbers<[1], [0], [0], [1], [0, 0, 1, 1], [], []>} : vector<8x8xf32>, vector<8x8xf32>, vector<8x8xf32> -> vector<8x8xf32>
    %112 = vector.extract_strided_slice %53 {offsets = [16, 0], sizes = [8, 32], strides = [1, 1]} : vector<32x32xf32> to vector<8x32xf32>
    %cst_55 = arith.constant dense<0.000000e+00> : vector<8x32xf32>
    %113 = tpu.matmul %111, %112, %cst_55 {dimension_numbers = #tpu.dot_dimension_numbers<[1], [0], [0], [1], [0, 0, 1, 1], [], []>} : vector<8x8xf32>, vector<8x32xf32>, vector<8x32xf32> -> vector<8x32xf32>
    %114 = arith.addf %94, %113 : vector<8x32xf32>
    %115 = vector.extract_strided_slice %51 {offsets = [0, 24], sizes = [8, 8], strides = [1, 1]} : vector<8x128xf32> to vector<8x8xf32>
    %116 = vector.extract_strided_slice %51 {offsets = [0, 56], sizes = [8, 8], strides = [1, 1]} : vector<8x128xf32> to vector<8x8xf32>
    %117 = vector.extract_strided_slice %51 {offsets = [0, 88], sizes = [8, 8], strides = [1, 1]} : vector<8x128xf32> to vector<8x8xf32>
    %cst_56 = arith.constant dense<0.000000e+00> : vector<8x8xf32>
    %118 = tpu.matmul %115, %116, %cst_56 {dimension_numbers = #tpu.dot_dimension_numbers<[1], [1], [0], [0], [0, 0, 1, 0], [], []>} : vector<8x8xf32>, vector<8x8xf32>, vector<8x8xf32> -> vector<8x8xf32>
    %119 = vector.broadcast %17 : vector<1x8xf32> to vector<8x8xf32>
    %120 = arith.addf %118, %119 : vector<8x8xf32>
    %cst_57 = arith.constant dense<0xFF800000> : vector<8xf32>
    %121 = vector.multi_reduction <maximumf>, %120, %cst_57 [1] : vector<8x8xf32> to vector<8xf32>
    %122 = vector.shape_cast %121 : vector<8xf32> to vector<8x1xf32>
    %123 = vector.broadcast %122 : vector<8x1xf32> to vector<8x8xf32>
    %124 = arith.subf %120, %123 : vector<8x8xf32>
    %125 = math.exp %124 : vector<8x8xf32>
    %cst_58 = arith.constant dense<0.000000e+00> : vector<8xf32>
    %126 = vector.multi_reduction <add>, %125, %cst_58 [1] : vector<8x8xf32> to vector<8xf32>
    %127 = vector.shape_cast %126 : vector<8xf32> to vector<8x1xf32>
    %128 = tpu.reciprocal %127 {approx = true} : vector<8x1xf32> -> vector<8x1xf32>
    %129 = vector.broadcast %128 : vector<8x1xf32> to vector<8x8xf32>
    %130 = arith.mulf %125, %129 : vector<8x8xf32>
    %cst_59 = arith.constant dense<0.000000e+00> : vector<8x8xf32>
    %131 = tpu.matmul %130, %117, %cst_59 {dimension_numbers = #tpu.dot_dimension_numbers<[1], [0], [0], [1], [0, 0, 1, 1], [], []>} : vector<8x8xf32>, vector<8x8xf32>, vector<8x8xf32> -> vector<8x8xf32>
    %132 = vector.extract_strided_slice %53 {offsets = [24, 0], sizes = [8, 32], strides = [1, 1]} : vector<32x32xf32> to vector<8x32xf32>
    %cst_60 = arith.constant dense<0.000000e+00> : vector<8x32xf32>
    %133 = tpu.matmul %131, %132, %cst_60 {dimension_numbers = #tpu.dot_dimension_numbers<[1], [0], [0], [1], [0, 0, 1, 1], [], []>} : vector<8x8xf32>, vector<8x32xf32>, vector<8x32xf32> -> vector<8x32xf32>
    %134 = arith.addf %114, %133 : vector<8x32xf32>
    %c0_61 = arith.constant 0 : index
    %c0_62 = arith.constant 0 : index
    %c0_63 = arith.constant 0 : index
    %135 = vector.load %arg13[%c0_61, %c0_62, %c0_63] : memref<2x1x32xf32, #tpu.memory_space<vmem>>, vector<1x1x32xf32>
    %136 = vector.shape_cast %135 : vector<1x1x32xf32> to vector<1x32xf32>
    %137 = vector.broadcast %136 : vector<1x32xf32> to vector<8x32xf32>
    %138 = arith.addf %134, %137 : vector<8x32xf32>
    %139 = arith.addf %44, %3 : vector<8x32xf32>
    %cst_64 = arith.constant 0.999994993 : f32
    %140 = vector.broadcast %cst_64 : f32 to vector<8x32xf32>
    %141 = arith.mulf %139, %140 : vector<8x32xf32>
    %142 = arith.addf %138, %3 : vector<8x32xf32>
    %cst_65 = arith.constant 0.999994993 : f32
    %143 = vector.broadcast %cst_65 : f32 to vector<8x32xf32>
    %144 = arith.mulf %142, %143 : vector<8x32xf32>
    %145 = arith.addf %141, %144 : vector<8x32xf32>
    %c0_66 = arith.constant 0 : index
    %c0_67 = arith.constant 0 : index
    %c0_68 = arith.constant 0 : index
    %146 = vector.load %arg14[%c0_66, %c0_67, %c0_68] : memref<2x32x64xf32, #tpu.memory_space<vmem>>, vector<1x32x64xf32>
    %147 = vector.shape_cast %146 : vector<1x32x64xf32> to vector<32x64xf32>
    %cst_69 = arith.constant dense<0.000000e+00> : vector<8x64xf32>
    %148 = tpu.matmul %145, %147, %cst_69 {dimension_numbers = #tpu.dot_dimension_numbers<[1], [0], [0], [1], [0, 0, 1, 1], [], []>} : vector<8x32xf32>, vector<32x64xf32>, vector<8x64xf32> -> vector<8x64xf32>
    %c0_70 = arith.constant 0 : index
    %c0_71 = arith.constant 0 : index
    %c0_72 = arith.constant 0 : index
    %149 = vector.load %arg15[%c0_70, %c0_71, %c0_72] : memref<2x1x64xf32, #tpu.memory_space<vmem>>, vector<1x1x64xf32>
    %150 = vector.shape_cast %149 : vector<1x1x64xf32> to vector<1x64xf32>
    %151 = vector.broadcast %150 : vector<1x64xf32> to vector<8x64xf32>
    %152 = arith.addf %148, %151 : vector<8x64xf32>
    %cst_73 = arith.constant 0.000000e+00 : f32
    %153 = vector.broadcast %cst_73 : f32 to vector<8x64xf32>
    %154 = arith.maximumf %152, %153 : vector<8x64xf32>
    %c0_74 = arith.constant 0 : index
    %c0_75 = arith.constant 0 : index
    %c0_76 = arith.constant 0 : index
    %155 = vector.load %arg16[%c0_74, %c0_75, %c0_76] : memref<2x64x32xf32, #tpu.memory_space<vmem>>, vector<1x64x32xf32>
    %156 = vector.shape_cast %155 : vector<1x64x32xf32> to vector<64x32xf32>
    %cst_77 = arith.constant dense<0.000000e+00> : vector<8x32xf32>
    %157 = tpu.matmul %154, %156, %cst_77 {dimension_numbers = #tpu.dot_dimension_numbers<[1], [0], [0], [1], [0, 0, 1, 1], [], []>} : vector<8x64xf32>, vector<64x32xf32>, vector<8x32xf32> -> vector<8x32xf32>
    %c0_78 = arith.constant 0 : index
    %c0_79 = arith.constant 0 : index
    %c0_80 = arith.constant 0 : index
    %158 = vector.load %arg17[%c0_78, %c0_79, %c0_80] : memref<2x1x32xf32, #tpu.memory_space<vmem>>, vector<1x1x32xf32>
    %159 = vector.shape_cast %158 : vector<1x1x32xf32> to vector<1x32xf32>
    %160 = vector.broadcast %159 : vector<1x32xf32> to vector<8x32xf32>
    %161 = arith.addf %157, %160 : vector<8x32xf32>
    %162 = arith.addf %145, %161 : vector<8x32xf32>
    %cst_81 = arith.constant 0.999994993 : f32
    %163 = vector.broadcast %cst_81 : f32 to vector<8x32xf32>
    %164 = arith.mulf %162, %163 : vector<8x32xf32>
    %cst_82 = arith.constant dense<0.000000e+00> : vector<16x32xf32>
    %165 = tpu.matmul %6, %164, %cst_82 {dimension_numbers = #tpu.dot_dimension_numbers<[1], [0], [0], [1], [0, 0, 1, 1], [], []>} : vector<16x8xf32>, vector<8x32xf32>, vector<16x32xf32> -> vector<16x32xf32>
    %166 = arith.addf %165, %11 : vector<16x32xf32>
    %cst_83 = arith.constant 0.000000e+00 : f32
    %167 = vector.broadcast %cst_83 : f32 to vector<16x32xf32>
    %168 = arith.maximumf %166, %167 : vector<16x32xf32>
    %cst_84 = arith.constant dense<0.000000e+00> : vector<8x32xf32>
    %169 = tpu.matmul %9, %168, %cst_84 {dimension_numbers = #tpu.dot_dimension_numbers<[1], [0], [0], [1], [0, 0, 1, 1], [], []>} : vector<8x16xf32>, vector<16x32xf32>, vector<8x32xf32> -> vector<8x32xf32>
    %170 = arith.addf %164, %169 : vector<8x32xf32>
    %c1 = arith.constant 1 : index
    %c0_85 = arith.constant 0 : index
    %c0_86 = arith.constant 0 : index
    %171 = vector.load %arg6[%c1, %c0_85, %c0_86] : memref<2x32x32xf32, #tpu.memory_space<vmem>>, vector<1x32x32xf32>
    %172 = vector.shape_cast %171 : vector<1x32x32xf32> to vector<32x32xf32>
    %cst_87 = arith.constant dense<0.000000e+00> : vector<8x32xf32>
    %173 = tpu.matmul %170, %172, %cst_87 {dimension_numbers = #tpu.dot_dimension_numbers<[1], [0], [0], [1], [0, 0, 1, 1], [], []>} : vector<8x32xf32>, vector<32x32xf32>, vector<8x32xf32> -> vector<8x32xf32>
    %c1_88 = arith.constant 1 : index
    %c0_89 = arith.constant 0 : index
    %c0_90 = arith.constant 0 : index
    %174 = vector.load %arg7[%c1_88, %c0_89, %c0_90] : memref<2x1x32xf32, #tpu.memory_space<vmem>>, vector<1x1x32xf32>
    %175 = vector.shape_cast %174 : vector<1x1x32xf32> to vector<1x32xf32>
    %176 = vector.broadcast %175 : vector<1x32xf32> to vector<8x32xf32>
    %177 = arith.addf %173, %176 : vector<8x32xf32>
    %cst_91 = arith.constant 0.000000e+00 : f32
    %178 = vector.broadcast %cst_91 : f32 to vector<8x32xf32>
    %179 = arith.maximumf %177, %178 : vector<8x32xf32>
    %c1_92 = arith.constant 1 : index
    %c0_93 = arith.constant 0 : index
    %c0_94 = arith.constant 0 : index
    %180 = vector.load %arg8[%c1_92, %c0_93, %c0_94] : memref<2x32x32xf32, #tpu.memory_space<vmem>>, vector<1x32x32xf32>
    %181 = vector.shape_cast %180 : vector<1x32x32xf32> to vector<32x32xf32>
    %cst_95 = arith.constant dense<0.000000e+00> : vector<8x32xf32>
    %182 = tpu.matmul %179, %181, %cst_95 {dimension_numbers = #tpu.dot_dimension_numbers<[1], [0], [0], [1], [0, 0, 1, 1], [], []>} : vector<8x32xf32>, vector<32x32xf32>, vector<8x32xf32> -> vector<8x32xf32>
    %c1_96 = arith.constant 1 : index
    %c0_97 = arith.constant 0 : index
    %c0_98 = arith.constant 0 : index
    %183 = vector.load %arg9[%c1_96, %c0_97, %c0_98] : memref<2x1x32xf32, #tpu.memory_space<vmem>>, vector<1x1x32xf32>
    %184 = vector.shape_cast %183 : vector<1x1x32xf32> to vector<1x32xf32>
    %185 = vector.broadcast %184 : vector<1x32xf32> to vector<8x32xf32>
    %186 = arith.addf %182, %185 : vector<8x32xf32>
    %c1_99 = arith.constant 1 : index
    %c0_100 = arith.constant 0 : index
    %c0_101 = arith.constant 0 : index
    %187 = vector.load %arg10[%c1_99, %c0_100, %c0_101] : memref<2x32x128xf32, #tpu.memory_space<vmem>>, vector<1x32x128xf32>
    %188 = vector.shape_cast %187 : vector<1x32x128xf32> to vector<32x128xf32>
    %cst_102 = arith.constant dense<0.000000e+00> : vector<8x128xf32>
    %189 = tpu.matmul %164, %188, %cst_102 {dimension_numbers = #tpu.dot_dimension_numbers<[1], [0], [0], [1], [0, 0, 1, 1], [], []>} : vector<8x32xf32>, vector<32x128xf32>, vector<8x128xf32> -> vector<8x128xf32>
    %c1_103 = arith.constant 1 : index
    %c0_104 = arith.constant 0 : index
    %c0_105 = arith.constant 0 : index
    %190 = vector.load %arg11[%c1_103, %c0_104, %c0_105] : memref<2x1x128xf32, #tpu.memory_space<vmem>>, vector<1x1x128xf32>
    %191 = vector.shape_cast %190 : vector<1x1x128xf32> to vector<1x128xf32>
    %192 = vector.broadcast %191 : vector<1x128xf32> to vector<8x128xf32>
    %193 = arith.addf %189, %192 : vector<8x128xf32>
    %c1_106 = arith.constant 1 : index
    %c0_107 = arith.constant 0 : index
    %c0_108 = arith.constant 0 : index
    %194 = vector.load %arg12[%c1_106, %c0_107, %c0_108] : memref<2x32x32xf32, #tpu.memory_space<vmem>>, vector<1x32x32xf32>
    %195 = vector.shape_cast %194 : vector<1x32x32xf32> to vector<32x32xf32>
    %cst_109 = arith.constant 0.000000e+00 : f32
    %196 = vector.broadcast %cst_109 : f32 to vector<8x32xf32>
    %197 = vector.extract_strided_slice %193 {offsets = [0, 0], sizes = [8, 8], strides = [1, 1]} : vector<8x128xf32> to vector<8x8xf32>
    %198 = vector.extract_strided_slice %193 {offsets = [0, 32], sizes = [8, 8], strides = [1, 1]} : vector<8x128xf32> to vector<8x8xf32>
    %199 = vector.extract_strided_slice %193 {offsets = [0, 64], sizes = [8, 8], strides = [1, 1]} : vector<8x128xf32> to vector<8x8xf32>
    %cst_110 = arith.constant dense<0.000000e+00> : vector<8x8xf32>
    %200 = tpu.matmul %197, %198, %cst_110 {dimension_numbers = #tpu.dot_dimension_numbers<[1], [1], [0], [0], [0, 0, 1, 0], [], []>} : vector<8x8xf32>, vector<8x8xf32>, vector<8x8xf32> -> vector<8x8xf32>
    %201 = vector.broadcast %17 : vector<1x8xf32> to vector<8x8xf32>
    %202 = arith.addf %200, %201 : vector<8x8xf32>
    %cst_111 = arith.constant dense<0xFF800000> : vector<8xf32>
    %203 = vector.multi_reduction <maximumf>, %202, %cst_111 [1] : vector<8x8xf32> to vector<8xf32>
    %204 = vector.shape_cast %203 : vector<8xf32> to vector<8x1xf32>
    %205 = vector.broadcast %204 : vector<8x1xf32> to vector<8x8xf32>
    %206 = arith.subf %202, %205 : vector<8x8xf32>
    %207 = math.exp %206 : vector<8x8xf32>
    %cst_112 = arith.constant dense<0.000000e+00> : vector<8xf32>
    %208 = vector.multi_reduction <add>, %207, %cst_112 [1] : vector<8x8xf32> to vector<8xf32>
    %209 = vector.shape_cast %208 : vector<8xf32> to vector<8x1xf32>
    %210 = tpu.reciprocal %209 {approx = true} : vector<8x1xf32> -> vector<8x1xf32>
    %211 = vector.broadcast %210 : vector<8x1xf32> to vector<8x8xf32>
    %212 = arith.mulf %207, %211 : vector<8x8xf32>
    %cst_113 = arith.constant dense<0.000000e+00> : vector<8x8xf32>
    %213 = tpu.matmul %212, %199, %cst_113 {dimension_numbers = #tpu.dot_dimension_numbers<[1], [0], [0], [1], [0, 0, 1, 1], [], []>} : vector<8x8xf32>, vector<8x8xf32>, vector<8x8xf32> -> vector<8x8xf32>
    %214 = vector.extract_strided_slice %195 {offsets = [0, 0], sizes = [8, 32], strides = [1, 1]} : vector<32x32xf32> to vector<8x32xf32>
    %cst_114 = arith.constant dense<0.000000e+00> : vector<8x32xf32>
    %215 = tpu.matmul %213, %214, %cst_114 {dimension_numbers = #tpu.dot_dimension_numbers<[1], [0], [0], [1], [0, 0, 1, 1], [], []>} : vector<8x8xf32>, vector<8x32xf32>, vector<8x32xf32> -> vector<8x32xf32>
    %216 = arith.addf %196, %215 : vector<8x32xf32>
    %217 = vector.extract_strided_slice %193 {offsets = [0, 8], sizes = [8, 8], strides = [1, 1]} : vector<8x128xf32> to vector<8x8xf32>
    %218 = vector.extract_strided_slice %193 {offsets = [0, 40], sizes = [8, 8], strides = [1, 1]} : vector<8x128xf32> to vector<8x8xf32>
    %219 = vector.extract_strided_slice %193 {offsets = [0, 72], sizes = [8, 8], strides = [1, 1]} : vector<8x128xf32> to vector<8x8xf32>
    %cst_115 = arith.constant dense<0.000000e+00> : vector<8x8xf32>
    %220 = tpu.matmul %217, %218, %cst_115 {dimension_numbers = #tpu.dot_dimension_numbers<[1], [1], [0], [0], [0, 0, 1, 0], [], []>} : vector<8x8xf32>, vector<8x8xf32>, vector<8x8xf32> -> vector<8x8xf32>
    %221 = vector.broadcast %17 : vector<1x8xf32> to vector<8x8xf32>
    %222 = arith.addf %220, %221 : vector<8x8xf32>
    %cst_116 = arith.constant dense<0xFF800000> : vector<8xf32>
    %223 = vector.multi_reduction <maximumf>, %222, %cst_116 [1] : vector<8x8xf32> to vector<8xf32>
    %224 = vector.shape_cast %223 : vector<8xf32> to vector<8x1xf32>
    %225 = vector.broadcast %224 : vector<8x1xf32> to vector<8x8xf32>
    %226 = arith.subf %222, %225 : vector<8x8xf32>
    %227 = math.exp %226 : vector<8x8xf32>
    %cst_117 = arith.constant dense<0.000000e+00> : vector<8xf32>
    %228 = vector.multi_reduction <add>, %227, %cst_117 [1] : vector<8x8xf32> to vector<8xf32>
    %229 = vector.shape_cast %228 : vector<8xf32> to vector<8x1xf32>
    %230 = tpu.reciprocal %229 {approx = true} : vector<8x1xf32> -> vector<8x1xf32>
    %231 = vector.broadcast %230 : vector<8x1xf32> to vector<8x8xf32>
    %232 = arith.mulf %227, %231 : vector<8x8xf32>
    %cst_118 = arith.constant dense<0.000000e+00> : vector<8x8xf32>
    %233 = tpu.matmul %232, %219, %cst_118 {dimension_numbers = #tpu.dot_dimension_numbers<[1], [0], [0], [1], [0, 0, 1, 1], [], []>} : vector<8x8xf32>, vector<8x8xf32>, vector<8x8xf32> -> vector<8x8xf32>
    %234 = vector.extract_strided_slice %195 {offsets = [8, 0], sizes = [8, 32], strides = [1, 1]} : vector<32x32xf32> to vector<8x32xf32>
    %cst_119 = arith.constant dense<0.000000e+00> : vector<8x32xf32>
    %235 = tpu.matmul %233, %234, %cst_119 {dimension_numbers = #tpu.dot_dimension_numbers<[1], [0], [0], [1], [0, 0, 1, 1], [], []>} : vector<8x8xf32>, vector<8x32xf32>, vector<8x32xf32> -> vector<8x32xf32>
    %236 = arith.addf %216, %235 : vector<8x32xf32>
    %237 = vector.extract_strided_slice %193 {offsets = [0, 16], sizes = [8, 8], strides = [1, 1]} : vector<8x128xf32> to vector<8x8xf32>
    %238 = vector.extract_strided_slice %193 {offsets = [0, 48], sizes = [8, 8], strides = [1, 1]} : vector<8x128xf32> to vector<8x8xf32>
    %239 = vector.extract_strided_slice %193 {offsets = [0, 80], sizes = [8, 8], strides = [1, 1]} : vector<8x128xf32> to vector<8x8xf32>
    %cst_120 = arith.constant dense<0.000000e+00> : vector<8x8xf32>
    %240 = tpu.matmul %237, %238, %cst_120 {dimension_numbers = #tpu.dot_dimension_numbers<[1], [1], [0], [0], [0, 0, 1, 0], [], []>} : vector<8x8xf32>, vector<8x8xf32>, vector<8x8xf32> -> vector<8x8xf32>
    %241 = vector.broadcast %17 : vector<1x8xf32> to vector<8x8xf32>
    %242 = arith.addf %240, %241 : vector<8x8xf32>
    %cst_121 = arith.constant dense<0xFF800000> : vector<8xf32>
    %243 = vector.multi_reduction <maximumf>, %242, %cst_121 [1] : vector<8x8xf32> to vector<8xf32>
    %244 = vector.shape_cast %243 : vector<8xf32> to vector<8x1xf32>
    %245 = vector.broadcast %244 : vector<8x1xf32> to vector<8x8xf32>
    %246 = arith.subf %242, %245 : vector<8x8xf32>
    %247 = math.exp %246 : vector<8x8xf32>
    %cst_122 = arith.constant dense<0.000000e+00> : vector<8xf32>
    %248 = vector.multi_reduction <add>, %247, %cst_122 [1] : vector<8x8xf32> to vector<8xf32>
    %249 = vector.shape_cast %248 : vector<8xf32> to vector<8x1xf32>
    %250 = tpu.reciprocal %249 {approx = true} : vector<8x1xf32> -> vector<8x1xf32>
    %251 = vector.broadcast %250 : vector<8x1xf32> to vector<8x8xf32>
    %252 = arith.mulf %247, %251 : vector<8x8xf32>
    %cst_123 = arith.constant dense<0.000000e+00> : vector<8x8xf32>
    %253 = tpu.matmul %252, %239, %cst_123 {dimension_numbers = #tpu.dot_dimension_numbers<[1], [0], [0], [1], [0, 0, 1, 1], [], []>} : vector<8x8xf32>, vector<8x8xf32>, vector<8x8xf32> -> vector<8x8xf32>
    %254 = vector.extract_strided_slice %195 {offsets = [16, 0], sizes = [8, 32], strides = [1, 1]} : vector<32x32xf32> to vector<8x32xf32>
    %cst_124 = arith.constant dense<0.000000e+00> : vector<8x32xf32>
    %255 = tpu.matmul %253, %254, %cst_124 {dimension_numbers = #tpu.dot_dimension_numbers<[1], [0], [0], [1], [0, 0, 1, 1], [], []>} : vector<8x8xf32>, vector<8x32xf32>, vector<8x32xf32> -> vector<8x32xf32>
    %256 = arith.addf %236, %255 : vector<8x32xf32>
    %257 = vector.extract_strided_slice %193 {offsets = [0, 24], sizes = [8, 8], strides = [1, 1]} : vector<8x128xf32> to vector<8x8xf32>
    %258 = vector.extract_strided_slice %193 {offsets = [0, 56], sizes = [8, 8], strides = [1, 1]} : vector<8x128xf32> to vector<8x8xf32>
    %259 = vector.extract_strided_slice %193 {offsets = [0, 88], sizes = [8, 8], strides = [1, 1]} : vector<8x128xf32> to vector<8x8xf32>
    %cst_125 = arith.constant dense<0.000000e+00> : vector<8x8xf32>
    %260 = tpu.matmul %257, %258, %cst_125 {dimension_numbers = #tpu.dot_dimension_numbers<[1], [1], [0], [0], [0, 0, 1, 0], [], []>} : vector<8x8xf32>, vector<8x8xf32>, vector<8x8xf32> -> vector<8x8xf32>
    %261 = vector.broadcast %17 : vector<1x8xf32> to vector<8x8xf32>
    %262 = arith.addf %260, %261 : vector<8x8xf32>
    %cst_126 = arith.constant dense<0xFF800000> : vector<8xf32>
    %263 = vector.multi_reduction <maximumf>, %262, %cst_126 [1] : vector<8x8xf32> to vector<8xf32>
    %264 = vector.shape_cast %263 : vector<8xf32> to vector<8x1xf32>
    %265 = vector.broadcast %264 : vector<8x1xf32> to vector<8x8xf32>
    %266 = arith.subf %262, %265 : vector<8x8xf32>
    %267 = math.exp %266 : vector<8x8xf32>
    %cst_127 = arith.constant dense<0.000000e+00> : vector<8xf32>
    %268 = vector.multi_reduction <add>, %267, %cst_127 [1] : vector<8x8xf32> to vector<8xf32>
    %269 = vector.shape_cast %268 : vector<8xf32> to vector<8x1xf32>
    %270 = tpu.reciprocal %269 {approx = true} : vector<8x1xf32> -> vector<8x1xf32>
    %271 = vector.broadcast %270 : vector<8x1xf32> to vector<8x8xf32>
    %272 = arith.mulf %267, %271 : vector<8x8xf32>
    %cst_128 = arith.constant dense<0.000000e+00> : vector<8x8xf32>
    %273 = tpu.matmul %272, %259, %cst_128 {dimension_numbers = #tpu.dot_dimension_numbers<[1], [0], [0], [1], [0, 0, 1, 1], [], []>} : vector<8x8xf32>, vector<8x8xf32>, vector<8x8xf32> -> vector<8x8xf32>
    %274 = vector.extract_strided_slice %195 {offsets = [24, 0], sizes = [8, 32], strides = [1, 1]} : vector<32x32xf32> to vector<8x32xf32>
    %cst_129 = arith.constant dense<0.000000e+00> : vector<8x32xf32>
    %275 = tpu.matmul %273, %274, %cst_129 {dimension_numbers = #tpu.dot_dimension_numbers<[1], [0], [0], [1], [0, 0, 1, 1], [], []>} : vector<8x8xf32>, vector<8x32xf32>, vector<8x32xf32> -> vector<8x32xf32>
    %276 = arith.addf %256, %275 : vector<8x32xf32>
    %c1_130 = arith.constant 1 : index
    %c0_131 = arith.constant 0 : index
    %c0_132 = arith.constant 0 : index
    %277 = vector.load %arg13[%c1_130, %c0_131, %c0_132] : memref<2x1x32xf32, #tpu.memory_space<vmem>>, vector<1x1x32xf32>
    %278 = vector.shape_cast %277 : vector<1x1x32xf32> to vector<1x32xf32>
    %279 = vector.broadcast %278 : vector<1x32xf32> to vector<8x32xf32>
    %280 = arith.addf %276, %279 : vector<8x32xf32>
    %281 = arith.addf %186, %164 : vector<8x32xf32>
    %cst_133 = arith.constant 0.999994993 : f32
    %282 = vector.broadcast %cst_133 : f32 to vector<8x32xf32>
    %283 = arith.mulf %281, %282 : vector<8x32xf32>
    %284 = arith.addf %280, %164 : vector<8x32xf32>
    %cst_134 = arith.constant 0.999994993 : f32
    %285 = vector.broadcast %cst_134 : f32 to vector<8x32xf32>
    %286 = arith.mulf %284, %285 : vector<8x32xf32>
    %287 = arith.addf %283, %286 : vector<8x32xf32>
    %c1_135 = arith.constant 1 : index
    %c0_136 = arith.constant 0 : index
    %c0_137 = arith.constant 0 : index
    %288 = vector.load %arg14[%c1_135, %c0_136, %c0_137] : memref<2x32x64xf32, #tpu.memory_space<vmem>>, vector<1x32x64xf32>
    %289 = vector.shape_cast %288 : vector<1x32x64xf32> to vector<32x64xf32>
    %cst_138 = arith.constant dense<0.000000e+00> : vector<8x64xf32>
    %290 = tpu.matmul %287, %289, %cst_138 {dimension_numbers = #tpu.dot_dimension_numbers<[1], [0], [0], [1], [0, 0, 1, 1], [], []>} : vector<8x32xf32>, vector<32x64xf32>, vector<8x64xf32> -> vector<8x64xf32>
    %c1_139 = arith.constant 1 : index
    %c0_140 = arith.constant 0 : index
    %c0_141 = arith.constant 0 : index
    %291 = vector.load %arg15[%c1_139, %c0_140, %c0_141] : memref<2x1x64xf32, #tpu.memory_space<vmem>>, vector<1x1x64xf32>
    %292 = vector.shape_cast %291 : vector<1x1x64xf32> to vector<1x64xf32>
    %293 = vector.broadcast %292 : vector<1x64xf32> to vector<8x64xf32>
    %294 = arith.addf %290, %293 : vector<8x64xf32>
    %cst_142 = arith.constant 0.000000e+00 : f32
    %295 = vector.broadcast %cst_142 : f32 to vector<8x64xf32>
    %296 = arith.maximumf %294, %295 : vector<8x64xf32>
    %c1_143 = arith.constant 1 : index
    %c0_144 = arith.constant 0 : index
    %c0_145 = arith.constant 0 : index
    %297 = vector.load %arg16[%c1_143, %c0_144, %c0_145] : memref<2x64x32xf32, #tpu.memory_space<vmem>>, vector<1x64x32xf32>
    %298 = vector.shape_cast %297 : vector<1x64x32xf32> to vector<64x32xf32>
    %cst_146 = arith.constant dense<0.000000e+00> : vector<8x32xf32>
    %299 = tpu.matmul %296, %298, %cst_146 {dimension_numbers = #tpu.dot_dimension_numbers<[1], [0], [0], [1], [0, 0, 1, 1], [], []>} : vector<8x64xf32>, vector<64x32xf32>, vector<8x32xf32> -> vector<8x32xf32>
    %c1_147 = arith.constant 1 : index
    %c0_148 = arith.constant 0 : index
    %c0_149 = arith.constant 0 : index
    %300 = vector.load %arg17[%c1_147, %c0_148, %c0_149] : memref<2x1x32xf32, #tpu.memory_space<vmem>>, vector<1x1x32xf32>
    %301 = vector.shape_cast %300 : vector<1x1x32xf32> to vector<1x32xf32>
    %302 = vector.broadcast %301 : vector<1x32xf32> to vector<8x32xf32>
    %303 = arith.addf %299, %302 : vector<8x32xf32>
    %304 = arith.addf %287, %303 : vector<8x32xf32>
    %cst_150 = arith.constant 0.999994993 : f32
    %305 = vector.broadcast %cst_150 : f32 to vector<8x32xf32>
    %306 = arith.mulf %304, %305 : vector<8x32xf32>
    %307 = vector.broadcast %22 : vector<8x1xf32> to vector<8x32xf32>
    %308 = arith.mulf %306, %307 : vector<8x32xf32>
    %cst_151 = arith.constant dense<0.000000e+00> : vector<32xf32>
    %309 = vector.multi_reduction <add>, %308, %cst_151 [0] : vector<8x32xf32> to vector<32xf32>
    %310 = vector.shape_cast %309 : vector<32xf32> to vector<1x32xf32>
    %c0_152 = arith.constant 0 : index
    %c0_153 = arith.constant 0 : index
    %c0_154 = arith.constant 0 : index
    %311 = vector.load %arg18[%c0_152, %c0_153, %c0_154] : memref<1x1x32xf32, #tpu.memory_space<vmem>>, vector<1x1x32xf32>
    %312 = vector.shape_cast %311 : vector<1x1x32xf32> to vector<1x32xf32>
    %313 = vector.shape_cast %310 : vector<1x32xf32> to vector<1x1x32xf32>
    tpu.vector_store %arg18[%c0_152, %c0_153, %c0_154], %313 {strides = array<i32>} : memref<1x1x32xf32, #tpu.memory_space<vmem>>, vector<1x1x32xf32>,
    return
  }
  func.func @transform_0(%arg0: i32, %arg1: memref<2xi32, #tpu.memory_space<smem>>) -> (i32, i32, i32) {
    %c0_i32 = arith.constant 0 : i32
    %c0_i32_0 = arith.constant 0 : i32
    %c0_i32_1 = arith.constant 0 : i32
    return %arg0, %c0_i32, %c0_i32_0 : i32, i32, i32
  }
  func.func @transform_1(%arg0: i32, %arg1: memref<2xi32, #tpu.memory_space<smem>>) -> (i32, i32, i32) {
    %c0_i32 = arith.constant 0 : i32
    %c0_i32_0 = arith.constant 0 : i32
    %c0_i32_1 = arith.constant 0 : i32
    return %arg0, %c0_i32, %c0_i32_0 : i32, i32, i32
  }
  func.func @transform_2(%arg0: i32, %arg1: memref<2xi32, #tpu.memory_space<smem>>) -> (i32, i32, i32) {
    %c0_i32 = arith.constant 0 : i32
    %c0_i32_0 = arith.constant 0 : i32
    %c0_i32_1 = arith.constant 0 : i32
    return %arg0, %c0_i32, %c0_i32_0 : i32, i32, i32
  }
  func.func @transform_3(%arg0: i32, %arg1: memref<2xi32, #tpu.memory_space<smem>>) -> (i32, i32, i32) {
    %c0_i32 = arith.constant 0 : i32
    %c0_i32_0 = arith.constant 0 : i32
    %c0_i32_1 = arith.constant 0 : i32
    return %arg0, %c0_i32, %c0_i32_0 : i32, i32, i32
  }
  func.func @transform_4(%arg0: i32, %arg1: memref<2xi32, #tpu.memory_space<smem>>) -> (i32, i32, i32) {
    %c0_i32 = arith.constant 0 : i32
    %c0_i32_0 = arith.constant 0 : i32
    %c0_i32_1 = arith.constant 0 : i32
    %c0_i32_2 = arith.constant 0 : i32
    return %c0_i32, %c0_i32_0, %c0_i32_1 : i32, i32, i32
  }
  func.func @transform_5(%arg0: i32, %arg1: memref<2xi32, #tpu.memory_space<smem>>) -> (i32, i32, i32) {
    %c0_i32 = arith.constant 0 : i32
    %c0_i32_0 = arith.constant 0 : i32
    %c0_i32_1 = arith.constant 0 : i32
    %c0_i32_2 = arith.constant 0 : i32
    return %c0_i32, %c0_i32_0, %c0_i32_1 : i32, i32, i32
  }
  func.func @transform_6(%arg0: i32, %arg1: memref<2xi32, #tpu.memory_space<smem>>) -> (i32, i32, i32) {
    %c0_i32 = arith.constant 0 : i32
    %c0_i32_0 = arith.constant 0 : i32
    %c0_i32_1 = arith.constant 0 : i32
    %c0_i32_2 = arith.constant 0 : i32
    return %c0_i32, %c0_i32_0, %c0_i32_1 : i32, i32, i32
  }
  func.func @transform_7(%arg0: i32, %arg1: memref<2xi32, #tpu.memory_space<smem>>) -> (i32, i32, i32) {
    %c0_i32 = arith.constant 0 : i32
    %c0_i32_0 = arith.constant 0 : i32
    %c0_i32_1 = arith.constant 0 : i32
    %c0_i32_2 = arith.constant 0 : i32
    return %c0_i32, %c0_i32_0, %c0_i32_1 : i32, i32, i32
  }
  func.func @transform_8(%arg0: i32, %arg1: memref<2xi32, #tpu.memory_space<smem>>) -> (i32, i32, i32) {
    %c0_i32 = arith.constant 0 : i32
    %c0_i32_0 = arith.constant 0 : i32
    %c0_i32_1 = arith.constant 0 : i32
    %c0_i32_2 = arith.constant 0 : i32
    return %c0_i32, %c0_i32_0, %c0_i32_1 : i32, i32, i32
  }
  func.func @transform_9(%arg0: i32, %arg1: memref<2xi32, #tpu.memory_space<smem>>) -> (i32, i32, i32) {
    %c0_i32 = arith.constant 0 : i32
    %c0_i32_0 = arith.constant 0 : i32
    %c0_i32_1 = arith.constant 0 : i32
    %c0_i32_2 = arith.constant 0 : i32
    return %c0_i32, %c0_i32_0, %c0_i32_1 : i32, i32, i32
  }
  func.func @transform_10(%arg0: i32, %arg1: memref<2xi32, #tpu.memory_space<smem>>) -> (i32, i32, i32) {
    %c0_i32 = arith.constant 0 : i32
    %c0_i32_0 = arith.constant 0 : i32
    %c0_i32_1 = arith.constant 0 : i32
    %c0_i32_2 = arith.constant 0 : i32
    return %c0_i32, %c0_i32_0, %c0_i32_1 : i32, i32, i32
  }
  func.func @transform_11(%arg0: i32, %arg1: memref<2xi32, #tpu.memory_space<smem>>) -> (i32, i32, i32) {
    %c0_i32 = arith.constant 0 : i32
    %c0_i32_0 = arith.constant 0 : i32
    %c0_i32_1 = arith.constant 0 : i32
    %c0_i32_2 = arith.constant 0 : i32
    return %c0_i32, %c0_i32_0, %c0_i32_1 : i32, i32, i32
  }
  func.func @transform_12(%arg0: i32, %arg1: memref<2xi32, #tpu.memory_space<smem>>) -> (i32, i32, i32) {
    %c0_i32 = arith.constant 0 : i32
    %c0_i32_0 = arith.constant 0 : i32
    %c0_i32_1 = arith.constant 0 : i32
    %c0_i32_2 = arith.constant 0 : i32
    return %c0_i32, %c0_i32_0, %c0_i32_1 : i32, i32, i32
  }
  func.func @transform_13(%arg0: i32, %arg1: memref<2xi32, #tpu.memory_space<smem>>) -> (i32, i32, i32) {
    %c0_i32 = arith.constant 0 : i32
    %c0_i32_0 = arith.constant 0 : i32
    %c0_i32_1 = arith.constant 0 : i32
    %c0_i32_2 = arith.constant 0 : i32
    return %c0_i32, %c0_i32_0, %c0_i32_1 : i32, i32, i32
  }
  func.func @transform_14(%arg0: i32, %arg1: memref<2xi32, #tpu.memory_space<smem>>) -> (i32, i32, i32) {
    %c0_i32 = arith.constant 0 : i32
    %c0_i32_0 = arith.constant 0 : i32
    %c0_i32_1 = arith.constant 0 : i32
    %c0_i32_2 = arith.constant 0 : i32
    return %c0_i32, %c0_i32_0, %c0_i32_1 : i32, i32, i32
  }
  func.func @transform_15(%arg0: i32, %arg1: memref<2xi32, #tpu.memory_space<smem>>) -> (i32, i32, i32) {
    %c0_i32 = arith.constant 0 : i32
    %c0_i32_0 = arith.constant 0 : i32
    %c0_i32_1 = arith.constant 0 : i32
    %c0_i32_2 = arith.constant 0 : i32
    return %c0_i32, %c0_i32_0, %c0_i32_1 : i32, i32, i32
  }
  func.func @transform_16(%arg0: i32, %arg1: memref<2xi32, #tpu.memory_space<smem>>) -> (i32, i32, i32) {
    %c0_i32 = arith.constant 0 : i32
    %c0_i32_0 = arith.constant 0 : i32
    %c0_i32_1 = arith.constant 0 : i32
    return %arg0, %c0_i32, %c0_i32_0 : i32, i32, i32
  }
}

</mosaic_0001>

<bundles_post_ra>
// kernel: gps_forward.1
= control target key start
LH: loop header
LB: loop body
LE: loop exit
PB: predicated region body
PF: predicated region fallthrough
CT: control target
= control target key end

     0   :  { %s2170_s27 = smov [#allocation3]   ;;  %s2761_s0 = inlined_call_operand.vmem [shape: s32[2], index: 0, kind: input, shape index: {}]   ;;  %s2762_s1 = inlined_call_operand.vmem [shape: f32[2,8,32], index: 1, kind: input, shape index: {}]   ;;  %s2763_s2 = inlined_call_operand.vmem [shape: bf16[2,16,8], index: 2, kind: input, shape index: {}]   ;;  %s2764_s3 = inlined_call_operand.vmem [shape: bf16[2,8,16], index: 3, kind: input, shape index: {}]   ;;  %s2765_s4 = inlined_call_operand.vmem [shape: f32[2,16,32], index: 4, kind: input, shape index: {}]   ;;  %s2766_s5 = inlined_call_operand.vmem [shape: f32[2,32,32], index: 5, kind: input, shape index: {}]   ;;  %s2767_s6 = inlined_call_operand.vmem [shape: f32[2,1,32], index: 6, kind: input, shape index: {}]   ;;  %s2768_s7 = inlined_call_operand.vmem [shape: f32[2,32,32], index: 7, kind: input, shape index: {}]   ;;  %s2769_s8 = inlined_call_operand.vmem [shape: f32[2,1,32], index: 8, kind: input, shape index: {}]   ;;  %s2770_s9 = inlined_call_operand.vmem [shape: f32[2,32,128], index: 9, kind: input, shape index: {}]   ;;  %s2771_s10 = inlined_call_operand.vmem [shape: f32[2,1,128], index: 10, kind: input, shape index: {}]   ;;  %s2772_s11 = inlined_call_operand.vmem [shape: f32[2,32,32], index: 11, kind: input, shape index: {}]   ;;  %s2773_s12 = inlined_call_operand.vmem [shape: f32[2,1,32], index: 12, kind: input, shape index: {}]   ;;  %s2774_s13 = inlined_call_operand.vmem [shape: f32[2,32,64], index: 13, kind: input, shape index: {}]   ;;  %s2775_s14 = inlined_call_operand.vmem [shape: f32[2,1,64], index: 14, kind: input, shape index: {}]   ;;  %s2776_s15 = inlined_call_operand.vmem [shape: f32[2,64,32], index: 15, kind: input, shape index: {}]   ;;  %s2777_s16 = inlined_call_operand.vmem [shape: f32[2,1,32], index: 16, kind: input, shape index: {}]   ;;  %s2778_s17 = inlined_call_operand.hbm [shape: f32[2,1,32], index: 17, kind: output, shape index: {}]  }
   0x1   :  { %2795 = sst [smem:[#allocation12_spill]] %s2761_s0 }
   0x2   :  { %2796 = sst [smem:[#allocation13_spill]] %s2762_s1 }
   0x3   :  { %2797 = sst [smem:[#allocation14_spill]] %s2763_s2 }
   0x4   :  { %2798 = sst [smem:[#allocation15_spill]] %s2769_s8 }
   0x5   :  { %s2799_s26 = sld [smem:[#allocation12_spill]] }
   0xb   :  { %s23_s8 = sshll.u32 %s2799_s26, 4  ;;  %s24_s8 = int_to_ptr.vmem [resolvable:$true] %s23_s8 }
   0xc   :  { %26 = dma.vmem_to_smem %s24_s8, 16, %s2170_s27, [#allocation2] }
   0xd   :  { %2148 = dma.done.wait [#allocation2], 16 }
   0xe   :  { %2149 = vsyncadd [#allocation2], 4294967280 }
   0xf   :  { %29 = sfence }
  0x10   :  { %30 = vsyncpa [#allocation5], 0 }
  0x11   :  { %32 = vsyncpa [#allocation5 + $0x1], 0  ;;  %s2277_s28 = smov 0   ;;  %s2279_s29 = smov 0  }
  0x12   :  { %s2281_s0 = smov 0   ;;  %s2283_s30 = smov 0  }
  0x13 LB: > { %2800 = sst [smem:[#allocation8_spill]] %s2164_s0  ;;  %s2298_s8 = sadd.s32 4294967295, %s2168_s30   ;;  %s2168_s30 = sphi %s2283_s30, %s2821_s30   ;;  %s2164_s0 = sphi %s2281_s0, %s2823_s0   ;;  %s2160_s29 = sphi %s2279_s29, %s2825_s29   ;;  %s2156_s28 = sphi %s2277_s28, %s2824_s28  }
  0x14   : > { %s1893_s18 = sadd.s32 4294967294, %s2168_s30   ;;  %s2302_s19 = sadd.s32 1, %s2168_s30  }
  0x15   : > { %2801 = sst [smem:[#allocation9_spill]] %s2302_s19  ;;  %s401_s1 = sadd.s32 1, %s2164_s0 }
  0x16   : > { %s398_s20 = ssub.s32 %s2168_s30, %s2302_s19  ;;  %p411_p0 = scmp.ne.s32.totalorder %s2164_s0, %s2160_s29 }
  0x17   : > { %p399_p1 = scmp.eq.s32.totalorder %s398_s20, 0  ;;  %p412_p2 = scmp.eq.s32.totalorder %s2298_s8, 1 }
  0x18   : > { %p417_p3 = scmp.ne.s32.totalorder %s2160_s29, %s2156_s28  ;;  %p418_p4 = scmp.eq.s32.totalorder %s1893_s18, 1 }
  0x19   : > { %s2313_s21 = scalar_select %p399_p1, %s2164_s0, %s401_s1  }
  0x1a   : > { %p2315_p5 = por %p412_p2, %p411_p0  ;;  %p2319_p6 = por %p418_p4, %p417_p3 }
  0x1b   : > { %2802 = sst [smem:[#allocation10_spill]] %s2313_s21  ;;  %p1896_p7 = scmp.ge.s32.totalorder %s2168_s30, 1 }
  0x1c   : > { %s2804_s23 = scalar_select %p2319_p6, 1, 0 }
  0x1d   : > { %p502_p8 = scmp.lt.s32.totalorder %s2168_s30, 3 }
  0x1e   : > { %2805 = sst [smem:[#allocation11_spill]] %s2804_s23 }
  0x1f   : > { %p503_p9 = pnand %p1896_p7, %p502_p8 }
  0x20   : > { %p564_p10 = scmp.lt.s32.totalorder (!%p503_p9), %s2298_s8, 1  ;;  %s2806_s18 = sld [smem:[#allocation13_spill]] (!%p503_p9) }
  0x21   : > { %506 = sbr.rel (%p503_p9) target bundleno = 3889 (0xf31), region = 84  ;;  %s2807_s2 = sld [smem:[#allocation14_spill]] (!%p503_p9) }
  0x22   : > { %s2793_s19 = smov (!%p503_p9), 96   ;;  %s2791_s23 = smov (!%p503_p9), 120  }
  0x23   : > { %s2784_s26 = smov (!%p503_p9), 72  }
  0x26   : > { %s565_s24 = scalar_select %p564_p10, %s2298_s8, 1  ;;  %vm602_vm0 = vcmask 64512   ;;  %v662_v4 = vld [vmem:[%s2766_s5 + $0x18] sm:$0xff]  ;;  %v661_v5 = vld [vmem:[%s2766_s5 + $0x10] sm:$0xff]  ;;  %vm634_vm1 = vcmask 130048   ;;  %v724_v18 = vld [vmem:[%s2770_s9 + $0x8] sm:$0xff]  ;;  %v592_v41 = vlaneseq }
  0x27   : > { %683 = vmatpush.msra.mxu2 %v662_v4  ;;  %v726_v16 = vld [vmem:[%s2770_s9 + $0x18] sm:$0xff]  ;;  %v725_v17 = vld [vmem:[%s2770_s9 + $0x10] sm:$0xff]  ;;  %v723_v19 = vld [vmem:[%s2770_s9] sm:$0xff]  ;;  %vm667_vm2 = vcmask 261120   ;;  %v2177_v44 = vmov -1e+30  }
  0x28   : > { %s1897_s25 = sshll.u32 %s565_s24, 3  ;;  %s1989_s27 = sshll.u32 %s565_s24, 4  ;;  %v660_v20 = vld [vmem:[%s2766_s5 + $0x8] sm:$0xff]  ;;  %v659_v21 = vld [vmem:[%s2766_s5] sm:$0xff]  ;;  %v695_v27 = vld [vmem:[%s2768_s7 + $0x18] sm:$0xff]  ;;  %v593_v42 = vand.u32 127, %v592_v41 }
  0x29   : > { %s567_s1 = scalar_lea.vmem %s2806_s18, %s1897_s25  ;;  %s572_s0 = scalar_lea.vmem %s2807_s2, %s1897_s25  ;;  %684 = vmatpush.msra.mxu2 %v661_v5  ;;  %v2048_v24 = vld [vmem:[%s2771_s10] ss:$0 sm:$0xff]  ;;  %715 = vmatpush.msra.mxu3 %v695_v27  ;;  %v694_v29 = vld [vmem:[%s2768_s7 + $0x10] sm:$0xff]  ;;  %v693_v30 = vld [vmem:[%s2768_s7 + $0x8] sm:$0xff]  ;;  %vm1165_vm4 = vcmask 523264   ;;  %vm1787_vm6 = vcmask 253952  }
  0x2a   : > { %v2333_v0 = vld [vmem:[%s567_s1] sm:$0xff]  ;;  %s581_s20 = scalar_lea.vmem %s2765_s4, %s1989_s27  ;;  %s1900_s2 = sshll.u32 %s565_s24, 2 }
  0x2b   : > { %v2335_v1 = vld [vmem:[%s572_s0] sm:$0xff]   ;;  %1994 = vmatpush.msra.mxu1 %v2333_v0  ;;  %624 = vmatpush.msra.mxu0 %v2333_v0  ;;  %v2356_v6 = vld [vmem:[%s581_s20 + $0x8] sm:$0xff]  ;;  %s576_s21 = scalar_lea.vmem %s2764_s3, %s1900_s2  ;;  %s2792_s2 = smov 88  }
  0x2c   : > { %v1993_v2 = vunpack.c.h.bf16 %v2335_v1  ;;  %v1992_v3 = vunpack.c.l.bf16 %v2335_v1  ;;  %v2358_v7 = vld [vmem:[%s581_s20] sm:$0xff]  ;;  %685 = vmatpush.msra.mxu2 %v660_v20  ;;  %s2790_s25 = smov 80   ;;  %s2785_s27 = smov 112   ;;  %716 = vmatpush.msra.mxu3 %v694_v29 }
  0x2d   : > { %v2365_v12 = vld [vmem:[%s576_s21] sm:$0xf]  ;;  %s2789_s20 = smov 104   ;;  %s2786_s21 = smov 48  }
  0x2e   : > { %1905 = vmatmul.msk.f32.vlgmr.msra.gmra.mxu1 %vm602_vm0, %v1993_v2  ;;  %1904 = vmatmul.msk.f32.vlgmr.msra.gmra.mxu0 %vm602_vm0, %v1992_v3  ;;  %v589_v15 = vunpack.c.l.bf16 %v2365_v12  ;;  %v692_v31 = vld [vmem:[%s2768_s7] sm:$0xff]  ;;  %s2787_s18 = smov 56   ;;  %s2788_s1 = smov 40   ;;  %v1944_v12 = vld [vmem:[%s2770_s9 + $0x28] sm:$0xff] }
  0x2f   : > { %686 = vmatpush.msra.mxu2 %v659_v21  ;;  %717 = vmatpush.msra.mxu3 %v693_v30  ;;  %v2049_v36 = vld [vmem:[%s2767_s6] ss:$0 sm:$0xff]  ;;  %s2813_s24 = smov 80   ;;  %s2814_s0 = smov 72  }
  0x31   : > { %718 = vmatpush.msra.mxu3 %v692_v31 }
  0xab   : > { %v629_v8 = vpop.f32.mrf.mxu1  ;;  %v626_v9 = vpop.f32.mrf.mxu0 }
  0xac   : > { %v630_v10 = vadd.f32 %v629_v8, %v2356_v6  ;;  %v627_v11 = vadd.f32 %v626_v9, %v2358_v7 }
  0xae   : > { %v633_v13 = vmax.f32 %v630_v10, 0.0  ;;  %v632_v14 = vmax.f32 %v627_v11, 0.0  ;;  %v754_v11 = vld [vmem:[%s2772_s11] sm:$0xff] }
  0xb0   : > { %652 = vmatpush.msrb.mxu1 %v633_v13 }
  0xb2   : > { %653 = vmatpush.msrb.mxu1 %v632_v14 }
  0xb3   : > { %1906 = vmatmul.msk.f32.vlgmr.msrb.gmra.mxu1 %vm634_vm1, %v589_v15 }
  0xb4   : > { %746 = vmatpush.msra.mxu1 %v726_v16 }
  0xb6   : > { %747 = vmatpush.msra.mxu1 %v725_v17 }
  0xb8   : > { %748 = vmatpush.msra.mxu1 %v724_v18 }
  0xba   : > { %749 = vmatpush.msra.mxu1 %v723_v19 }
  0xbb   : > { %1909 = vmatmul.msk.f32.vlgmr.msra.gmra.mxu1 %vm667_vm2, %v2333_v0 }
 0x130   : > { %v655_v22 = vpop.f32.mrf.mxu1 }
 0x131   : > { %v658_v23 = vadd.f32 %v655_v22, %v2333_v0 }
 0x133   : > { %1907 = vmatmul.msk.f32.vlgmr.msra.gmra.mxu2 %vm667_vm2, %v658_v23 }
 0x138   : > { %v751_v25 = vpop.f32.mrf.mxu1 }
 0x139   : > { %v2396_v26 = vadd.f32 %v2048_v24, %v751_v25 }
 0x13b   : > { %824 = vrot.lane.b32.xlu2 %v2396_v26, %s2792_s2  ;;  %759 = vrot.lane.b32.xlu0 %v2396_v26, %s2793_s19  ;;  %s2815_s2 = smov 112   ;;  %s2816_s19 = smov 104  }
 0x143   : > { %822 = vrot.lane.b32.xlu2 %v2396_v26, %s2791_s23  ;;  %s2811_s23 = smov 88  }
 0x14b   : > { %935 = vrot.lane.b32.xlu2 %v2396_v26, %s2790_s25  ;;  %s2812_s25 = smov 120  }
 0x153   : > { %1024 = vrot.lane.b32.xlu2 %v2396_v26, %s2784_s26  ;;  %s2434_s26 = sld [smem:[#allocation3 + %s2298_s8]] }
 0x159   : > { %v594_v43 = vstv %s2434_s26 }
 0x15a   : > { %vm595_vm3 = vcmp.lt.s32.totalorder %v593_v42, %v594_v43 }
 0x15b   : > { %933 = vrot.lane.b32.xlu2 %v2396_v26, %s2785_s27  ;;  %v2440_v45 = vsel %vm595_vm3, 0.0, %v2177_v44  ;;  %s2794_s27 = smov 64   ;;  %v756_v44 = vld [vmem:[%s2772_s11 + $0x10] sm:$0xff] }
 0x195   : > { %v825_v28 = vpop.permute.xlu2 %824 }
 0x196   : > { %1913 = vmatpush.xpose.msk.msrb.mxu0 %vm602_vm0, %v825_v28 }
 0x19d   : > { %v823_v32 = vpop.permute.xlu2 %822 }
 0x19e   : > { %1914 = vmatmul.msk.f32.vlgmr.msrb.gmra.mxu0 %vm602_vm0, %v823_v32 }
 0x1a5   : > { %v936_v33 = vpop.permute.xlu2 %935 }
 0x1a6   : > { %1918 = vmatpush.xpose.msk.msra.mxu0 %vm602_vm0, %v936_v33 }
 0x1ad   : > { %v1025_v34 = vpop.permute.xlu2 %1024  ;;  %v760_v35 = vpop.permute.xlu0 %759 }
 0x1ae   : > { %1910 = vmatpush.xpose.msk.msrb.mxu2 %vm602_vm0, %v760_v35 }
 0x1b1   : > { %1911 = vmatmul.msk.f32.vlgmr.msrb.gmra.mxu2 %vm602_vm0, %v2396_v26 }
 0x1b5   : > { %v934_v37 = vpop.permute.xlu2 %933 }
 0x1b6   : > { %v688_v38 = vpop.f32.mrf.mxu2  ;;  %1919 = vmatmul.msk.f32.vlgmr.msra.gmra.mxu0 %vm602_vm0, %v934_v37 }
 0x1b7   : > { %v689_v39 = vadd.f32 %v2049_v36, %v688_v38 }
 0x1b9   : > { %v691_v40 = vmax.f32 %v689_v39, 0.0 }
 0x1bb   : > { %1908 = vmatmul.msk.f32.vlgmr.msra.gmra.mxu3 %vm667_vm2, %v691_v40  ;;  %v755_v40 = vld [vmem:[%s2772_s11 + $0x8] sm:$0xff] }
 0x1bc   : > { %905 = vmatpush.msra.mxu2 %v755_v40 }
 0x1be   : > { %1016 = vmatpush.msrb.mxu2 %v756_v44  ;;  %v1939_v44 = vld [vmem:[%s2768_s7 + $0x30] sm:$0xff] }
 0x21b   : > { %v847_v46 = vpop.f32.mrf.mxu0 }
 0x21c   : > { %v848_v47 = vadd.f32 %v847_v46, %v2440_v45 }
 0x21e   : > { %v850_v48 = vsel %vm602_vm0, %v848_v47, -inf }
 0x21f   : > { %851 = vmax.xlane.f32.xlu2 %v850_v48 }
 0x233   : > { %v958_v62 = vpop.f32.mrf.mxu0 }
 0x234   : > { %v782_v49 = vpop.f32.mrf.mxu2  ;;  %v959_v63 = vadd.f32 %v958_v62, %v2440_v45 }
 0x235   : > { %v783_v50 = vadd.f32 %v782_v49, %v2440_v45 }
 0x236   : > { %v961_v4 = vsel %vm602_vm0, %v959_v63, -inf }
 0x237   : > { %v785_v51 = vsel %vm602_vm0, %v783_v50, -inf }
 0x238   : > { %786 = vmax.xlane.f32.xlu0 %v785_v51 }
 0x23e   : > { %v2461_v13 = vpop.f32.mrf.mxu3 }
 0x292   : > { %v852_v52 = vpop.xlane.xlu2 %851 }
 0x293   : > { %v853_v53 = vsub.f32 %v848_v47, %v852_v52  ;;  %v1124_v52 = vld [vmem:[%s2774_s13 + $0x18] sm:$0xff] }
 0x295   : > { %v854_v54 = vmul.f32 1.442695, %v853_v53  ;;  %v1123_v53 = vld [vmem:[%s2774_s13 + $0x10] sm:$0xff] }
 0x297   : > { %2060 = vpow2.f32 %v854_v54  ;;  %v1122_v54 = vld [vmem:[%s2774_s13 + $0x8] sm:$0xff] }
 0x29d   : > { %v2061_v55 = vpop.eup %2060 }
 0x29e   : > { %v856_v56 = vsel %vm602_vm0, %v2061_v55, 0.0 }
 0x29f   : > { %857 = vadd.xlane.f32.xlu0 %v856_v56  ;;  %v1160_v56 = vld [vmem:[%s2776_s15 + $0x38] sm:$0xff] }
 0x2ab   : > { %v787_v57 = vpop.xlane.xlu0 %786 }
 0x2ac   : > { %v788_v58 = vsub.f32 %v783_v50, %v787_v57  ;;  %v757_v50 = vld [vmem:[%s2772_s11 + $0x18] sm:$0xff]  ;;  %v1159_v57 = vld [vmem:[%s2776_s15 + $0x30] sm:$0xff] }
 0x2ae   : > { %v789_v59 = vmul.f32 1.442695, %v788_v58  ;;  %v1158_v58 = vld [vmem:[%s2776_s15 + $0x28] sm:$0xff] }
 0x2b0   : > { %2062 = vpow2.f32 %v789_v59  ;;  %v1157_v59 = vld [vmem:[%s2776_s15 + $0x20] sm:$0xff] }
 0x2b6   : > { %v2063_v60 = vpop.eup %2062 }
 0x2b7   : > { %v791_v61 = vsel %vm602_vm0, %v2063_v60, 0.0 }
 0x2b8   : > { %792 = vadd.xlane.f32.xlu1 %v791_v61 }
 0x2d1   : > { %796 = vrot.lane.b32.xlu1 %v2396_v26, %s2794_s27  ;;  %s2809_s27 = smov 64  }
 0x2d9   : > { %1022 = vrot.lane.b32.xlu1 %v2396_v26, %s2789_s20 }
 0x303   : > { %962 = vmax.xlane.f32.xlu1 %v961_v4 }
 0x312   : > { %v858_v27 = vpop.xlane.xlu0 %857 }
 0x31c   : > { %972 = vrot.lane.b32.xlu1 %v2396_v26, %s2786_s21  ;;  %s2808_s21 = sld [smem:[#allocation15_spill]] }
 0x322   : > { %v2050_v62 = vld [vmem:[%s2808_s21] ss:$0 sm:$0xff] }
 0x32b   : > { %v793_v5 = vpop.xlane.xlu1 %792 }
 0x32c   : > { %2064 = vrcp.f32 %v793_v5  ;;  %v721_v5 = vadd.f32 %v2050_v62, %v2461_v13  ;;  %v1155_v13 = vld [vmem:[%s2776_s15 + $0x10] sm:$0xff] }
 0x332   : > { %v2065_v8 = vpop.eup %2064 }
 0x333   : > { %v795_v10 = vmul.f32 %v2065_v8, %v2063_v60  ;;  %v1156_v60 = vld [vmem:[%s2776_s15 + $0x18] sm:$0xff] }
 0x343   : > { %v797_v9 = vpop.permute.xlu1 %796 }
 0x344   : > { %817 = vmatpush.msrb.mxu3 %v797_v9  ;;  %v2051_v9 = vld [vmem:[%s2773_s12] ss:$0 sm:$0xff] }
 0x345   : > { %1912 = vmatmul.msk.f32.vlgmr.msrb.gmra.mxu3 %vm602_vm0, %v795_v10 }
 0x346   : > { %928 = vmatpush.msra.mxu3 %v754_v11 }
 0x348   : > { %1922 = vmatpush.xpose.msk.msrb.mxu3 %vm602_vm0, %v1025_v34 }
 0x34b   : > { %v1023_v16 = vpop.permute.xlu1 %1022 }
 0x376   : > { %v963_v17 = vpop.xlane.xlu1 %962 }
 0x377   : > { %v964_v19 = vsub.f32 %v959_v63, %v963_v17 }
 0x379   : > { %v965_v20 = vmul.f32 1.442695, %v964_v19 }
 0x37b   : > { %2066 = vpow2.f32 %v965_v20 }
 0x381   : > { %v2067_v24 = vpop.eup %2066 }
 0x382   : > { %v967_v25 = vsel %vm602_vm0, %v2067_v24, 0.0 }
 0x38e   : > { %v973_v37 = vpop.permute.xlu1 %972 }
 0x3c8   : > { %v819_v14 = vpop.f32.mrf.mxu3 }
 0x3c9   : > { %1917 = vmatmul.msk.f32.vlgmr.msra.gmra.mxu3 %vm602_vm0, %v819_v14  ;;  %v1116_v14 = vadd.f32 %v721_v5, %v2333_v0 }
 0x3ca   : > { %1177 = vmatpush.msra.mxu3 %v1160_v56 }
 0x3cb   : > { %v1117_v19 = vmul.f32 0.999995, %v1116_v14 }
 0x3cc   : > { %1178 = vmatpush.msra.mxu3 %v1159_v57 }
 0x3ce   : > { %1179 = vmatpush.msra.mxu3 %v1158_v58 }
 0x3d0   : > { %1180 = vmatpush.msra.mxu3 %v1157_v59 }
 0x3d1   : > { %1923 = vmatmul.msk.f32.vlgmr.msrb.gmra.mxu3 %vm602_vm0, %v1023_v16 }
 0x3d2   : > { %1181 = vmatpush.msra.mxu3 %v1156_v60 }
 0x3d4   : > { %1182 = vmatpush.msra.mxu3 %v1155_v13 }
 0x44c   : > { %v2465_v18 = vpop.f32.mrf.mxu3 }
 0x454   : > { %v1047_v21 = vpop.f32.mrf.mxu3 }
 0x455   : > { %v1048_v22 = vadd.f32 %v1047_v21, %v2440_v45 }
 0x457   : > { %v1050_v23 = vsel %vm602_vm0, %v1048_v22, -inf }
 0x458   : > { %1051 = vmax.xlane.f32.xlu0 %v1050_v23 }
 0x460   : > { %968 = vadd.xlane.f32.xlu0 %v967_v25 }
 0x474   : > { %861 = vrot.lane.b32.xlu0 %v2396_v26, %s2787_s18 }
 0x4cb   : > { %v1052_v28 = vpop.xlane.xlu0 %1051 }
 0x4cc   : > { %v1053_v29 = vsub.f32 %v1048_v22, %v1052_v28  ;;  %v1153_v22 = vld [vmem:[%s2776_s15] sm:$0xff] }
 0x4ce   : > { %v1054_v30 = vmul.f32 1.442695, %v1053_v29 }
 0x4d0   : > { %2068 = vpow2.f32 %v1054_v30 }
 0x4d1   : > { %2070 = vrcp.f32 %v858_v27  ;;  %v2053_v27 = vld [vmem:[%s2777_s16] ss:$0 sm:$0xff] }
 0x4d3   : > { %v969_v33 = vpop.xlane.xlu0 %968 }
 0x4d4   : > { %2072 = vrcp.f32 %v969_v33  ;;  %v1933_v33 = vld [vmem:[%s2766_s5 + $0x30] sm:$0xff] }
 0x4d6   : > { %v2069_v31 = vpop.eup %2068 }
 0x4d7   : > { %v1056_v32 = vsel %vm602_vm0, %v2069_v31, 0.0  ;;  %v2071_v34 = vpop.eup %2070 }
 0x4d8   : > { %1057 = vadd.xlane.f32.xlu2 %v1056_v32  ;;  %v860_v35 = vmul.f32 %v2071_v34, %v2061_v55  ;;  %v1121_v55 = vld [vmem:[%s2774_s13] sm:$0xff]  ;;  %v1934_v32 = vld [vmem:[%s2766_s5 + $0x38] sm:$0xff] }
 0x4da   : > { %v2073_v38 = vpop.eup %2072 }
 0x4db   : > { %v971_v39 = vmul.f32 %v2073_v38, %v2067_v24  ;;  %v1931_v38 = vld [vmem:[%s2766_s5 + $0x20] sm:$0xff] }
 0x4e6   : > { %v862_v36 = vpop.permute.xlu0 %861 }
 0x4e7   : > { %882 = vmatpush.msrb.mxu1 %v862_v36 }
 0x4e8   : > { %1915 = vmatmul.msk.f32.vlgmr.msrb.gmra.mxu1 %vm602_vm0, %v860_v35 }
 0x4e9   : > { %993 = vmatpush.msra.mxu1 %v973_v37 }
 0x4eb   : > { %1105 = vmatpush.msrb.mxu1 %v757_v50 }
 0x4f0   : > { %1061 = vrot.lane.b32.xlu2 %v2396_v26, %s2788_s1  ;;  %1920 = vmatmul.msk.f32.vlgmr.msra.gmra.mxu1 %vm602_vm0, %v971_v39  ;;  %v1940_v39 = vld [vmem:[%s2768_s7 + $0x38] sm:$0xff]  ;;  %s2810_s1 = smov 96  }
 0x54b   : > { %v1058_v42 = vpop.xlane.xlu2 %1057 }
 0x54c   : > { %2074 = vrcp.f32 %v1058_v42 }
 0x552   : > { %v2075_v46 = vpop.eup %2074 }
 0x553   : > { %v1060_v47 = vmul.f32 %v2075_v46, %v2069_v31  ;;  %v1062_v48 = vpop.permute.xlu2 %1061  ;;  %v1938_v46 = vld [vmem:[%s2768_s7 + $0x28] sm:$0xff] }
 0x554   : > { %1082 = vmatpush.msrb.mxu0 %v1062_v48  ;;  %v2054_v48 = vld [vmem:[%s2767_s6 + $0x1] ss:$0 sm:$0xff] }
 0x555   : > { %1924 = vmatmul.msk.f32.vlgmr.msrb.gmra.mxu0 %vm602_vm0, %v1060_v47  ;;  %v1937_v47 = vld [vmem:[%s2768_s7 + $0x20] sm:$0xff] }
 0x565   : > { %v884_v26 = vpop.f32.mrf.mxu1 }
 0x566   : > { %1916 = vmatmul.msk.f32.vlgmr.msra.gmra.mxu2 %vm602_vm0, %v884_v26 }
 0x567   : > { %1144 = vmatpush.msra.mxu2 %v1124_v52 }
 0x569   : > { %1145 = vmatpush.msra.mxu2 %v1123_v53 }
 0x56b   : > { %1146 = vmatpush.msra.mxu2 %v1122_v54 }
 0x56d   : > { %v995_v49 = vpop.f32.mrf.mxu1  ;;  %1147 = vmatpush.msra.mxu2 %v1121_v55 }
 0x56e   : > { %1921 = vmatmul.msk.f32.vlgmr.msrb.gmra.mxu2 %vm602_vm0, %v995_v49 }
 0x56f   : > { %1262 = vmatpush.msrb.mxu2 %v1934_v32 }
 0x571   : > { %1263 = vmatpush.msrb.mxu2 %v1933_v33 }
 0x5d2   : > { %v1084_v51 = vpop.f32.mrf.mxu0 }
 0x5d3   : > { %1925 = vmatmul.msk.f32.vlgmr.msrb.gmra.mxu1 %vm602_vm0, %v1084_v51  ;;  %v2055_v51 = vld [vmem:[%s2771_s10 + $0x1] ss:$0 sm:$0xff] }
 0x5e9   : > { %v907_v61 = vpop.f32.mrf.mxu2 }
 0x5ea   : > { %v931_v4 = vadd.f32 %v2465_v18, %v907_v61  ;;  %v1154_v18 = vld [vmem:[%s2776_s15 + $0x8] sm:$0xff] }
 0x5eb   : > { %1183 = vmatpush.msra.mxu3 %v1154_v18 }
 0x5ed   : > { %1184 = vmatpush.msra.mxu3 %v1153_v22  ;;  %v1949_v22 = vld [vmem:[%s2772_s11 + $0x20] sm:$0xff] }
 0x5f1   : > { %v1018_v63 = vpop.f32.mrf.mxu2 }
 0x5f2   : > { %v1021_v8 = vadd.f32 %v1018_v63, %v931_v4 }
 0x650   : > { %v1107_v10 = vpop.f32.mrf.mxu1 }
 0x651   : > { %v1110_v11 = vadd.f32 %v1107_v10, %v1021_v8 }
 0x653   : > { %v1115_v16 = vadd.f32 %v2051_v9, %v1110_v11 }
 0x655   : > { %v1118_v17 = vadd.f32 %v1115_v16, %v2333_v0  ;;  %v2052_v0 = vld [vmem:[%s2775_s14] ss:$0 sm:$0xff] }
 0x657   : > { %v1119_v20 = vmul.f32 0.999995, %v1118_v17 }
 0x659   : > { %v1120_v21 = vadd.f32 %v1119_v20, %v1117_v19 }
 0x65b   : > { %1926 = vmatmul.msk.f32.vlgmr.msra.gmra.mxu2 %vm667_vm2, %v1120_v21 }
 0x6de   : > { %v1149_v23 = vpop.f32.mrf.mxu2 }
 0x6df   : > { %v1150_v24 = vadd.f32 %v2052_v0, %v1149_v23 }
 0x6e1   : > { %v1152_v25 = vmax.f32 %v1150_v24, 0.0 }
 0x6e3   : > { %1927 = vmatmul.msk.f32.vlgmr.msra.gmra.mxu3 %vm1165_vm4, %v1152_v25 }
 0x766   : > { %v1186_v28 = vpop.f32.mrf.mxu3 }
 0x767   : > { %v1187_v29 = vadd.f32 %v2053_v27, %v1186_v28 }
 0x769   : > { %v1189_v30 = vadd.f32 %v1187_v29, %v1120_v21 }
 0x76b   : > { %v2544_v31 = vmul.f32 0.999995, %v1189_v30 }
 0x76d   : > { %1206 = vmatpush.msra.mxu0 %v2544_v31 }
 0x76e   : > { %1928 = vmatmul.msk.f32.vlgmr.msra.gmra.mxu0 %vm602_vm0, %v1992_v3 }
 0x776   : > { %1929 = vmatmul.msk.f32.gmra.mxu0 %vm602_vm0, %v1993_v2  ;;  %v1932_v2 = vld [vmem:[%s2766_s5 + $0x28] sm:$0xff] }
 0x777   : > { %1264 = vmatpush.msrb.mxu2 %v1932_v2 }
 0x779   : > { %1265 = vmatpush.msrb.mxu2 %v1931_v38  ;;  %v1950_v38 = vld [vmem:[%s2772_s11 + $0x28] sm:$0xff] }
 0x7eb   : > { %v1208_v34 = vpop.f32.mrf.mxu0 }
 0x7ec   : > { %v1209_v36 = vadd.f32 %v1208_v34, %v2358_v7  ;;  %v1945_v7 = vld [vmem:[%s2770_s9 + $0x30] sm:$0xff] }
 0x7ee   : > { %v1214_v1 = vmax.f32 %v1209_v36, 0.0 }
 0x7f3   : > { %v1211_v35 = vpop.f32.mrf.mxu0 }
 0x7f4   : > { %v1212_v3 = vadd.f32 %v1211_v35, %v2356_v6  ;;  %v1946_v6 = vld [vmem:[%s2770_s9 + $0x38] sm:$0xff] }
 0x7f5   : > { %1329 = vmatpush.msra.mxu2 %v1946_v6 }
 0x7f6   : > { %v1215_v37 = vmax.f32 %v1212_v3, 0.0 }
 0x7f7   : > { %1330 = vmatpush.msra.mxu2 %v1945_v7 }
 0x7f8   : > { %1230 = vmatpush.msra.mxu1 %v1215_v37 }
 0x7f9   : > { %1331 = vmatpush.msra.mxu2 %v1944_v12 }
 0x7fa   : > { %1231 = vmatpush.msra.mxu1 %v1214_v1 }
 0x7fb   : > { %1930 = vmatmul.msk.f32.vlgmr.msra.gmra.mxu1 %vm634_vm1, %v589_v15  ;;  %v1943_v15 = vld [vmem:[%s2770_s9 + $0x20] sm:$0xff] }
 0x7fc   : > { %1332 = vmatpush.msra.mxu2 %v1943_v15  ;;  %1296 = vmatpush.msrb.mxu1 %v1940_v39 }
 0x7fe   : > { %1297 = vmatpush.msrb.mxu1 %v1939_v44 }
 0x800   : > { %1298 = vmatpush.msrb.mxu1 %v1938_v46 }
 0x802   : > { %1299 = vmatpush.msrb.mxu1 %v1937_v47 }
 0x878   : > { %v1233_v40 = vpop.f32.mrf.mxu1 }
 0x879   : > { %v1236_v42 = vadd.f32 %v1233_v40, %v2544_v31 }
 0x87b   : > { %1936 = vmatmul.msk.f32.vlgmr.msrb.gmra.mxu2 %vm667_vm2, %v1236_v42 }
 0x883   : > { %1948 = vmatmul.msk.f32.vlgmr.msra.gmra.mxu2 %vm667_vm2, %v2544_v31 }
 0x8fe   : > { %v1267_v26 = vpop.f32.mrf.mxu2 }
 0x8ff   : > { %v1268_v49 = vadd.f32 %v2054_v48, %v1267_v26 }
 0x901   : > { %v1270_v50 = vmax.f32 %v1268_v49, 0.0 }
 0x903   : > { %1942 = vmatmul.msk.f32.vlgmr.msrb.gmra.mxu1 %vm667_vm2, %v1270_v50  ;;  %v1951_v50 = vld [vmem:[%s2772_s11 + $0x30] sm:$0xff] }
 0x906   : > { %v1334_v52 = vpop.f32.mrf.mxu2 }
 0x907   : > { %v2605_v53 = vadd.f32 %v2055_v51, %v1334_v52 }
 0x909   : > { %1380 = vrot.lane.b32.xlu2 %v2605_v53, %s2809_s27  ;;  %1343 = vrot.lane.b32.xlu0 %v2605_v53, %s2810_s1  ;;  %s2817_s27 = smov 56   ;;  %s562_s1 = sand.u32 1, %s2160_s29  }
 0x90a   : > { %s563_s26 = scalar_lea.vmem [#allocation4], %s562_s1 }
 0x911   : > { %1408 = vrot.lane.b32.xlu2 %v2605_v53, %s2811_s23  ;;  %s2124_s23 = scalar_lea.hbm %s2778_s17, 2 }
 0x919   : > { %1406 = vrot.lane.b32.xlu2 %v2605_v53, %s2812_s25  ;;  %s2818_s25 = smov 48  }
 0x921   : > { %1519 = vrot.lane.b32.xlu2 %v2605_v53, %s2813_s24  ;;  %s2819_s24 = smov 40  }
 0x929   : > { %1608 = vrot.lane.b32.xlu2 %v2605_v53, %s2814_s0  ;;  %s1800_s0 = sshll.u32 %s563_s26, 4  ;;  %s1801_s0 = int_to_ptr.vmem [resolvable:$true] %s1800_s0 }
 0x963   : > { %v1381_v54 = vpop.permute.xlu2 %1380 }
 0x964   : > { %1401 = vmatpush.msrb.mxu0 %v1381_v54 }
 0x966   : > { %1512 = vmatpush.msra.mxu0 %v1949_v22 }
 0x96b   : > { %v1409_v55 = vpop.permute.xlu2 %1408 }
 0x96c   : > { %1956 = vmatpush.xpose.msk.msra.mxu1 %vm602_vm0, %v1409_v55 }
 0x973   : > { %v1407_v56 = vpop.permute.xlu2 %1406 }
 0x974   : > { %1957 = vmatmul.msk.f32.vlgmr.msra.gmra.mxu1 %vm602_vm0, %v1407_v56 }
 0x97b   : > { %v1520_v57 = vpop.permute.xlu2 %1519  ;;  %v1344_v58 = vpop.permute.xlu0 %1343 }
 0x97c   : > { %1953 = vmatpush.xpose.msk.msrb.mxu3 %vm602_vm0, %v1344_v58  ;;  %1961 = vmatpush.xpose.msk.msrb.mxu1 %vm602_vm0, %v1520_v57  ;;  %v1973_v58 = vld [vmem:[%s2774_s13 + $0x38] sm:$0xff] }
 0x97f   : > { %1954 = vmatmul.msk.f32.vlgmr.msrb.gmra.mxu3 %vm602_vm0, %v2605_v53 }
 0x980   : > { %v2625_v59 = vpop.f32.mrf.mxu1  ;;  %1489 = vmatpush.msra.mxu3 %v1950_v38 }
 0x982   : > { %1600 = vmatpush.msrb.mxu3 %v1951_v50 }
 0x983   : > { %v1609_v8 = vpop.permute.xlu2 %1608 }
 0x9f1   : > { %v1431_v60 = vpop.f32.mrf.mxu1 }
 0x9f2   : > { %v1432_v61 = vadd.f32 %v1431_v60, %v2440_v45  ;;  %v1972_v60 = vld [vmem:[%s2774_s13 + $0x30] sm:$0xff] }
 0x9f4   : > { %v1434_v62 = vsel %vm602_vm0, %v1432_v61, -inf }
 0x9f5   : > { %1435 = vmax.xlane.f32.xlu2 %v1434_v62  ;;  %v1970_v62 = vld [vmem:[%s2774_s13 + $0x20] sm:$0xff] }
 0xa02   : > { %v1366_v63 = vpop.f32.mrf.mxu3 }
 0xa03   : > { %v1367_v4 = vadd.f32 %v1366_v63, %v2440_v45  ;;  %v1983_v63 = vld [vmem:[%s2776_s15 + $0x78] sm:$0xff] }
 0xa05   : > { %v1369_v5 = vsel %vm602_vm0, %v1367_v4, -inf }
 0xa06   : > { %1370 = vmax.xlane.f32.xlu0 %v1369_v5  ;;  %v1981_v5 = vld [vmem:[%s2776_s15 + $0x68] sm:$0xff] }
 0xa1a   : > { %1517 = vrot.lane.b32.xlu0 %v2605_v53, %s2815_s2 }
 0xa68   : > { %v1436_v9 = vpop.xlane.xlu2 %1435 }
 0xa69   : > { %v1437_v10 = vsub.f32 %v1432_v61, %v1436_v9  ;;  %v1971_v61 = vld [vmem:[%s2774_s13 + $0x28] sm:$0xff]  ;;  %v1979_v9 = vld [vmem:[%s2776_s15 + $0x58] sm:$0xff] }
 0xa6b   : > { %v1438_v11 = vmul.f32 1.442695, %v1437_v10 }
 0xa6d   : > { %2076 = vpow2.f32 %v1438_v11  ;;  %v2056_v11 = vld [vmem:[%s2808_s21 + $0x1] ss:$0 sm:$0xff] }
 0xa73   : > { %v2077_v14 = vpop.eup %2076 }
 0xa74   : > { %v1440_v16 = vsel %vm602_vm0, %v2077_v14, 0.0 }
 0xa75   : > { %1441 = vadd.xlane.f32.xlu2 %v1440_v16 }
 0xa79   : > { %v1371_v17 = vpop.xlane.xlu0 %1370 }
 0xa7a   : > { %v1372_v19 = vsub.f32 %v1367_v4, %v1371_v17  ;;  %v1982_v4 = vld [vmem:[%s2776_s15 + $0x70] sm:$0xff]  ;;  %v1302_v17 = vadd.f32 %v2056_v11, %v2625_v59 }
 0xa7b   : > { %v1978_v59 = vld [vmem:[%s2776_s15 + $0x50] sm:$0xff] }
 0xa7c   : > { %v1373_v20 = vmul.f32 1.442695, %v1372_v19 }
 0xa7e   : > { %2078 = vpow2.f32 %v1373_v20  ;;  %v2057_v20 = vld [vmem:[%s2773_s12 + $0x1] ss:$0 sm:$0xff] }
 0xa84   : > { %v2079_v21 = vpop.eup %2078 }
 0xa85   : > { %v1375_v13 = vsel %vm602_vm0, %v2079_v21, 0.0 }
 0xa86   : > { %1376 = vadd.xlane.f32.xlu1 %v1375_v13 }
 0xa8c   : > { %v1518_v18 = vpop.permute.xlu0 %1517 }
 0xa8d   : > { %1962 = vmatmul.msk.f32.vlgmr.msrb.gmra.mxu1 %vm602_vm0, %v1518_v18  ;;  %v1701_v18 = vadd.f32 %v1302_v17, %v2544_v31 }
 0xa9f   : > { %1606 = vrot.lane.b32.xlu1 %v2605_v53, %s2816_s19  ;;  %s1790_s19 = scalar_lea.sflag [#allocation5], %s562_s1 }
 0xae8   : > { %v1442_v34 = vpop.xlane.xlu2 %1441 }
 0xaf9   : > { %v1377_v0 = vpop.xlane.xlu1 %1376 }
 0xafa   : > { %2080 = vrcp.f32 %v1377_v0 }
 0xb00   : > { %v2081_v23 = vpop.eup %2080 }
 0xb01   : > { %v1379_v24 = vmul.f32 %v2081_v23, %v2079_v21  ;;  %v1702_v23 = vmul.f32 0.999995, %v1701_v18 }
 0xb03   : > { %1955 = vmatmul.msk.f32.vlgmr.msrb.gmra.mxu0 %vm602_vm0, %v1379_v24 }
 0xb04   : > { %1965 = vmatpush.xpose.msk.msrb.mxu0 %vm602_vm0, %v1609_v8  ;;  %v1980_v8 = vld [vmem:[%s2776_s15 + $0x60] sm:$0xff] }
 0xb0a   : > { %v1542_v25 = vpop.f32.mrf.mxu1 }
 0xb0b   : > { %v1543_v27 = vadd.f32 %v1542_v25, %v2440_v45 }
 0xb0d   : > { %v1545_v28 = vsel %vm602_vm0, %v1543_v27, -inf }
 0xb0e   : > { %1546 = vmax.xlane.f32.xlu0 %v1545_v28  ;;  %v2058_v28 = vld [vmem:[%s2775_s14 + $0x1] ss:$0 sm:$0xff] }
 0xb11   : > { %v1607_v35 = vpop.permute.xlu1 %1606 }
 0xb22   : > { %1445 = vrot.lane.b32.xlu0 %v2605_v53, %s2817_s27 }
 0xb80   : > { %v1403_v29 = vpop.f32.mrf.mxu0 }
 0xb81   : > { %1960 = vmatmul.msk.f32.vlgmr.msra.gmra.mxu0 %vm602_vm0, %v1403_v29  ;;  %v1547_v30 = vpop.xlane.xlu0 %1546 }
 0xb82   : > { %v1548_v32 = vsub.f32 %v1543_v27, %v1547_v30  ;;  %1765 = vmatpush.msra.mxu0 %v1983_v63  ;;  %v1977_v27 = vld [vmem:[%s2776_s15 + $0x48] sm:$0xff] }
 0xb84   : > { %v1549_v33 = vmul.f32 1.442695, %v1548_v32  ;;  %1766 = vmatpush.msra.mxu0 %v1982_v4 }
 0xb86   : > { %2082 = vpow2.f32 %v1549_v33  ;;  %1767 = vmatpush.msra.mxu0 %v1981_v5  ;;  %v598_v33 = vshrl.u32 %v592_v41, 7 }
 0xb87   : > { %2084 = vrcp.f32 %v1442_v34  ;;  %v2059_v34 = vld [vmem:[%s2777_s16 + $0x1] ss:$0 sm:$0xff] }
 0xb88   : > { %1768 = vmatpush.msra.mxu0 %v1980_v8  ;;  %vm599_vm5 = vcmp.lt.s32.totalorder %v598_v33, %v594_v43 }
 0xb89   : > { %1966 = vmatmul.msk.f32.vlgmr.msrb.gmra.mxu0 %vm602_vm0, %v1607_v35 }
 0xb8a   : > { %1769 = vmatpush.msra.mxu0 %v1979_v9 }
 0xb8c   : > { %v2083_v36 = vpop.eup %2082  ;;  %1770 = vmatpush.msra.mxu0 %v1978_v59 }
 0xb8d   : > { %v1551_v3 = vsel %vm602_vm0, %v2083_v36, 0.0  ;;  %v2085_v37 = vpop.eup %2084 }
 0xb8e   : > { %1552 = vadd.xlane.f32.xlu2 %v1551_v3  ;;  %v1444_v1 = vmul.f32 %v2085_v37, %v2077_v14  ;;  %1771 = vmatpush.msra.mxu0 %v1977_v27  ;;  %v2183_v37 = vmov 0.0  }
 0xb94   : > { %v1446_v2 = vpop.permute.xlu0 %1445 }
 0xb95   : > { %1466 = vmatpush.msrb.mxu2 %v1446_v2 }
 0xb96   : > { %1958 = vmatmul.msk.f32.vlgmr.msrb.gmra.mxu2 %vm602_vm0, %v1444_v1  ;;  %v1903_v1 = vsel %vm599_vm5, 1.0, %v2183_v37 }
 0xbfe   : > { %v1514_v6 = vpop.f32.mrf.mxu0 }
 0xc01   : > { %v1553_v47 = vpop.xlane.xlu2 %1552 }
 0xc06   : > { %v1631_v7 = vpop.f32.mrf.mxu0 }
 0xc07   : > { %v1632_v12 = vadd.f32 %v1631_v7, %v2440_v45 }
 0xc09   : > { %v1634_v15 = vsel %vm602_vm0, %v1632_v12, -inf }
 0xc0a   : > { %1635 = vmax.xlane.f32.xlu1 %v1634_v15 }
 0xc19   : > { %v1468_v39 = vpop.f32.mrf.mxu2 }
 0xc1a   : > { %1959 = vmatmul.msk.f32.vlgmr.msra.gmra.mxu3 %vm602_vm0, %v1468_v39 }
 0xc1b   : > { %1731 = vmatpush.msra.mxu3 %v1973_v58 }
 0xc1d   : > { %1732 = vmatpush.msra.mxu3 %v1972_v60 }
 0xc1f   : > { %1733 = vmatpush.msra.mxu3 %v1971_v61 }
 0xc21   : > { %1734 = vmatpush.msra.mxu3 %v1970_v62 }
 0xc23   : > { %1556 = vrot.lane.b32.xlu1 %v2605_v53, %s2818_s25 }
 0xc7d   : > { %v1636_v40 = vpop.xlane.xlu1 %1635 }
 0xc7e   : > { %v1637_v42 = vsub.f32 %v1632_v12, %v1636_v40 }
 0xc80   : > { %v1638_v44 = vmul.f32 1.442695, %v1637_v42 }
 0xc82   : > { %2086 = vpow2.f32 %v1638_v44 }
 0xc83   : > { %2088 = vrcp.f32 %v1553_v47 }
 0xc88   : > { %v2087_v46 = vpop.eup %2086 }
 0xc89   : > { %v1640_v48 = vsel %vm602_vm0, %v2087_v46, 0.0  ;;  %v2089_v45 = vpop.eup %2088 }
 0xc8a   : > { %1641 = vadd.xlane.f32.xlu2 %v1640_v48  ;;  %v1555_v26 = vmul.f32 %v2089_v45, %v2083_v36 }
 0xc95   : > { %v1557_v49 = vpop.permute.xlu1 %1556 }
 0xc96   : > { %1577 = vmatpush.msra.mxu2 %v1557_v49 }
 0xc97   : > { %1963 = vmatmul.msk.f32.vlgmr.msra.gmra.mxu2 %vm602_vm0, %v1555_v26 }
 0xc9d   : > { %v1491_v10 = vpop.f32.mrf.mxu3 }
 0xc9e   : > { %v1515_v16 = vadd.f32 %v1514_v6, %v1491_v10 }
 0xca2   : > { %1645 = vrot.lane.b32.xlu2 %v2605_v53, %s2819_s24  ;;  %v1952_v53 = vld [vmem:[%s2772_s11 + $0x38] sm:$0xff]  ;;  %s1798_s24 = scalar_lea.hbm %s2778_s17, %s2298_s8 }
 0xca3   : > { %1689 = vmatpush.msrb.mxu2 %v1952_v53  ;;  %s1802_s2 = sshll.u32 %s1798_s24, 4  ;;  %s1803_s2 = int_to_ptr.hbm [resolvable:$true] %s1802_s2 }
 0xca4   : > { %s2118_s18 = sshra.s32 %s1803_s2, 4  ;;  %s2119_s18 = int_to_ptr.hbm [resolvable:$true] %s2118_s18 }
 0xca5   : > { %s2120_s20 = scalar_lea.hbm %s2119_s18, 1  ;;  %p2125_p0 = scmp.lt.s32.totalorder %s2119_s18, %s2778_s17 }
 0xca6   : > { %p2121_p11 = scmp.ne.s32.totalorder %s2119_s18, %s2120_s20  ;;  %p2126_p1 = scmp.lt.s32.totalorder %s2124_s23, %s2120_s20 }
 0xca8   : > { %p2122_p12 = pnand %p2121_p11, %p2315_p5  ;;  %p2127_p2 = por %p2126_p1, %p2125_p0 }
 0xcaa   : > { %p2123_p13 = pneg %p2122_p12 }
 0xcac   : > { %p2128_p3 = pnand %p2127_p2, %p2123_p13 }
 0xcfd   : > { %v1642_v51 = vpop.xlane.xlu2 %1641 }
 0xcfe   : > { %2090 = vrcp.f32 %v1642_v51 }
 0xd04   : > { %v2091_v52 = vpop.eup %2090 }
 0xd05   : > { %v1644_v54 = vmul.f32 %v2091_v52, %v2087_v46  ;;  %v1646_v55 = vpop.permute.xlu2 %1645 }
 0xd06   : > { %1666 = vmatpush.msra.mxu1 %v1646_v55 }
 0xd07   : > { %1967 = vmatmul.msk.f32.vlgmr.msra.gmra.mxu1 %vm602_vm0, %v1644_v54 }
 0xd1a   : > { %v1579_v56 = vpop.f32.mrf.mxu2 }
 0xd1b   : > { %1964 = vmatmul.msk.f32.vlgmr.msrb.gmra.mxu3 %vm602_vm0, %v1579_v56 }
 0xd84   : > { %v1668_v57 = vpop.f32.mrf.mxu1 }
 0xd85   : > { %1968 = vmatmul.msk.f32.vlgmr.msrb.gmra.mxu2 %vm602_vm0, %v1668_v57 }
 0xd9e   : > { %v1602_v14 = vpop.f32.mrf.mxu3 }
 0xd9f   : > { %v1605_v19 = vadd.f32 %v1602_v14, %v1515_v16 }
 0xe08   : > { %v1691_v21 = vpop.f32.mrf.mxu2 }
 0xe09   : > { %v1694_v13 = vadd.f32 %v1691_v21, %v1605_v19 }
 0xe0b   : > { %v1700_v22 = vadd.f32 %v2057_v20, %v1694_v13 }
 0xe0d   : > { %v1703_v0 = vadd.f32 %v1700_v22, %v2544_v31  ;;  %v1976_v31 = vld [vmem:[%s2776_s15 + $0x40] sm:$0xff] }
 0xe0e   : > { %1772 = vmatpush.msra.mxu0 %v1976_v31 }
 0xe0f   : > { %v1704_v24 = vmul.f32 0.999995, %v1703_v0 }
 0xe11   : > { %v1705_v25 = vadd.f32 %v1704_v24, %v1702_v23 }
 0xe13   : > { %1975 = vmatmul.msk.f32.vlgmr.msra.gmra.mxu3 %vm667_vm2, %v1705_v25 }
 0xe96   : > { %v1736_v29 = vpop.f32.mrf.mxu3 }
 0xe97   : > { %v1737_v30 = vadd.f32 %v2058_v28, %v1736_v29 }
 0xe99   : > { %v1739_v32 = vmax.f32 %v1737_v30, 0.0 }
 0xe9b   : > { %1985 = vmatmul.msk.f32.vlgmr.msra.gmra.mxu0 %vm1165_vm4, %v1739_v32 }
 0xf18   : > { %v1774_v35 = vpop.f32.mrf.mxu0 }
 0xf19   : > { %v1775_v36 = vadd.f32 %v2059_v34, %v1774_v35 }
 0xf1b   : > { %v1777_v3 = vadd.f32 %v1775_v36, %v1705_v25 }
 0xf1d   : > { %v1778_v2 = vmul.f32 0.999995, %v1777_v3 }
 0xf1f   : > { %v1779_v38 = vmul.f32 %v1903_v1, %v1778_v2 }
 0xf21   : > { %v1780_v6 = vsel %vm667_vm2, %v1779_v38, 0.0 }
 0xf22   : > { %v1781_v7 = vrot.slane %v1780_v6, 4 }
 0xf24   : > { %v1782_v12 = vadd.f32 %v1781_v7, %v1780_v6 }
 0xf26   : > { %v1783_v15 = vrot.slane %v1782_v12, 2 }
 0xf28   : > { %v1784_v41 = vadd.f32 %v1783_v15, %v1782_v12 }
 0xf2a   : > { %v1785_v43 = vrot.slane %v1784_v41, 1 }
 0xf2c   : > { %v1786_v39 = vadd.f32 %v1785_v43, %v1784_v41 }
 0xf2e   : > { %1788 = vst.msk [vmem:[%s563_s26] sm:$0x1] %vm1787_vm6, %v1786_v39 }
 0xf2f   : > { %2131 = shalt.err (!%p2128_p3)
}
 0xf30   : > { %1995 = dma.vmem_to_hbm [thread:$0]  (%p2315_p5), %s1801_s0, 16, %s1803_s2, %s1790_s19  }
 0xf31 PF: > { %p2001_p4 = scmp.ge.s32.totalorder %s2168_s30, 2  ;;  %s1814_s26 = sand.u32 1, %s2156_s28  }
 0xf32   : > { %s1815_s8 = scalar_lea.sflag [#allocation5], %s1814_s26 }
 0xf33   : > { %p1998_p7 = pnand %p2001_p4, %p2319_p6 }
 0xf35   : > { %p1999_p8 = pneg %p1998_p7 }
 0xf37   : > { %2151 = dma.done.wait (%p1999_p8), %s1815_s8, 16  }
 0xf38   : > { %2153 = vsyncadd (%p1999_p8), %s1815_s8, 4294967280  ;;  %s2821_s30 = sld [smem:[#allocation9_spill]]  ;;  %s2824_s28 = smov %s2160_s29 }
 0xf39   : > { %s2822_s18 = sld [smem:[#allocation8_spill]] }
 0xf3a   : > { %s2823_s0 = sld [smem:[#allocation10_spill]] }
 0xf3e   : > { %p35_p9 = scmp.ge.s32.totalorder %s2821_s30, 4  }
 0xf3f   : > { %s2825_s29 = smov %s2822_s18 }
 0xf40   :  { %37 = sbr.rel (!%p35_p9) target bundleno = 19 (0x13), region = 140 }
 0xf45   :  { %1820 = vsyncpa [#allocation5], 1 }
 0xf46   :  { %1822 = vsyncpa [#allocation5 + $0x1], 1 }

</bundles_post_ra>
